<compile_context>
chip_gen: v6e
topology: v6e:2x2x1
jax: 0.10.0
libtpu: 0.0.40
codegen_flags: <defaults>
</compile_context>

<pallas_src>
import jax
import jax.numpy as jnp
from jax.experimental import pallas as pl
from jax.experimental.pallas import tpu as pltpu

NUM_OUT_FEATURES = 4
FEAT = 1000            # resnet101 output width
FEAT_PAD = 1024        # padded to a multiple of the 128-lane vreg width
H0 = 512
H1 = 64
H1_PAD = 128           # lane-dense hidden dim
OUT_PAD = 128          # head output padded to one full vreg lane width


def _round_up(n, m):
    return ((n + m - 1) // m) * m


def _fine_classifier_kernel(
    x_ref,       # [BT, C, HWT]       f32  (one batch x HW tile of the image)
    fcw_ref,     # [C, FEAT_PAD]      f32  (stand-in backbone proj; 1/(H*W) folded in)
    fcb_ref,     # [1, FEAT_PAD]      f32
    w0_ref,      # [FEAT_PAD, H0]     bf16 (Linear0 weight, transposed, zero-padded rows)
    b0_ref,      # [1, H0]            f32
    w1_ref,      # [H0, H1_PAD]       bf16 (Linear1 weight, transposed, zero-padded cols)
    b1_ref,      # [1, H1_PAD]        f32
    w2_ref,      # [H1_PAD, OUT_PAD]  bf16 (Linear2 weight, transposed, zero-padded)
    b2_ref,      # [1, OUT_PAD]       f32
    o_ref,       # [BT, OUT_PAD]      f32
    pooled_acc,  # [BT, C]            f32  VMEM scratch (global-pool accumulator)
):
    hw = pl.program_id(1)

    @pl.when(hw == 0)
    def _():
        pooled_acc[...] = jnp.zeros_like(pooled_acc)

    # --- stand-in resnet101 backbone, part 1: global pool over this HW tile.
    # x is already f32, so the reduce accumulates in f32 with no whole-tile
    # cast temporary.
    pooled_acc[...] += jnp.sum(x_ref[...], axis=2)

    @pl.when(hw == pl.num_programs(1) - 1)
    def _():
        pooled = pooled_acc[...]                               # [BT, C] f32
        bt, c = pooled.shape

        # --- backbone part 2: projection C -> FEAT_PAD. C is tiny (RGB), so
        # do it as C broadcast-FMAs on the VPU in full f32 rather than a
        # K=C MXU pass (negligible work, better precision).
        feat = jnp.broadcast_to(fcb_ref[...], (bt, FEAT_PAD))
        for ch in range(c):                                    # static, small
            feat = feat + pooled[:, ch:ch + 1] * fcw_ref[ch:ch + 1, :]

        # --- classifier head: Linear0 -> ReLU -> Linear1 -> ReLU -> Linear2.
        # bf16 operands on the MXU, f32 accumulation, f32 bias/ReLU.
        h0 = jnp.dot(feat.astype(jnp.bfloat16), w0_ref[...],
                     preferred_element_type=jnp.float32) + b0_ref[...]
        h0 = jnp.maximum(h0, 0.0)                              # [BT, 512]

        h1 = jnp.dot(h0.astype(jnp.bfloat16), w1_ref[...],
                     preferred_element_type=jnp.float32) + b1_ref[...]
        h1 = jnp.maximum(h1, 0.0)                              # [BT, 128]

        o_ref[...] = jnp.dot(h1.astype(jnp.bfloat16), w2_ref[...],
                             preferred_element_type=jnp.float32) + b2_ref[...]


def _vmem_budgets():
    """(x-slab budget, vmem_limit_bytes), sized per TPU generation.

    v7x has 64 MiB physical VMEM per TensorCore; v5e/v6e have 128 MiB. Keep
    the double-buffered f32 x slab around a third of physical VMEM and leave
    headroom for the (double-buffered) weights, output buffer and
    intermediates.
    """
    try:
        vmem_bytes = int(pltpu.get_tpu_info().vmem_capacity_bytes)
    except Exception:           # no query available: assume the smallest (v7x)
        vmem_bytes = 64 * 1024 * 1024
    slab = max(8 * 1024 * 1024, vmem_bytes // 3)
    limit = min(vmem_bytes * 3 // 4, 96 * 1024 * 1024)
    return slab, limit


def _choose_tiles(batch, channels, hw, slab_budget):
    """Pick (batch_tile, hw_tile) for the 2-D grid.

    * batch tile targets 256 rows (full MXU M pass on v6e/v7x, 2x128 on v5e),
      stays a multiple of 8, and is halved until the batch grid has >= 2
      steps so both v7x TensorCores get work (harmless on 1-TC v5e/v6e).
    * hw tile is as large as the double-buffered f32 x slab budget allows
      (a multiple of 128 lanes, or all of HW when it fits), so the batch tile
      never collapses for large images.
    """
    b_tile = min(256, _round_up(batch, 8))
    while b_tile > 8 and pl.cdiv(batch, b_tile) < 2:
        b_tile = max(8, _round_up(b_tile // 2, 8))

    max_hw = slab_budget // (2 * b_tile * channels * 4)   # 2 buffers, f32
    if hw <= max_hw:
        hw_tile = hw
    else:
        hw_tile = max(128, (max_hw // 128) * 128)
    return b_tile, hw_tile


def fine_classifier_v3(x, prepared_params):
    """x: [B, C, H, W] float32 (NCHW). Returns [B, NUM_OUT_FEATURES] float32."""
    B, C, H, W = x.shape
    HW = H * W
    fcw, fcb, w0, b0, w1, b1, w2, b2 = prepared_params

    # Free reshape -- x stays f32 in HBM; no cast / channel-pad pass.
    x_r = x.reshape(B, C, HW)

    slab_budget, vmem_limit = _vmem_budgets()
    b_tile, hw_tile = _choose_tiles(B, C, HW, slab_budget)

    hw_steps = pl.cdiv(HW, hw_tile)
    if HW % hw_tile:
        # A ragged last HW tile would pull garbage into the pooling sum;
        # zero-padding HW is numerically exact for a sum (the 1/(H*W) scale is
        # folded into fcw). Batch raggedness needs no pad: rows are fully
        # independent, garbage boundary rows land only in output rows >= B,
        # which are sliced off below.
        x_r = jnp.pad(x_r, ((0, 0), (0, 0), (0, hw_steps * hw_tile - HW)))

    grid_b = pl.cdiv(B, b_tile)
    b_pad = grid_b * b_tile            # output rows padded -> full, unmasked stores
    grid = (grid_b, hw_steps)

    def _const(shape):
        zero = tuple(0 for _ in shape)
        return pl.BlockSpec(shape, lambda i, j, _z=zero: _z)

    in_specs = [
        pl.BlockSpec((b_tile, C, hw_tile), lambda i, j: (i, 0, j)),
        _const(fcw.shape), _const(fcb.shape),
        _const(w0.shape), _const(b0.shape),
        _const(w1.shape), _const(b1.shape),
        _const(w2.shape), _const(b2.shape),
    ]
    out_specs = pl.BlockSpec((b_tile, OUT_PAD), lambda i, j: (i, 0))

    flops = (B * C * HW                                    # pooling adds
             + 2 * B * (C * FEAT_PAD + FEAT_PAD * H0
                        + H0 * H1_PAD + H1_PAD * OUT_PAD))
    bytes_accessed = (int(x_r.size) * 4
                      + sum(int(p.size) * int(p.dtype.itemsize)
                            for p in prepared_params)
                      + int(b_pad) * OUT_PAD * 4)

    out_padded = pl.pallas_call(
        _fine_classifier_kernel,
        out_shape=jax.ShapeDtypeStruct((b_pad, OUT_PAD), jnp.float32),
        grid=grid,
        in_specs=in_specs,
        out_specs=out_specs,
        scratch_shapes=[pltpu.VMEM((b_tile, C), jnp.float32)],
        compiler_params=pltpu.CompilerParams(
            dimension_semantics=("parallel", "arbitrary"),
            vmem_limit_bytes=vmem_limit,
        ),
        cost_estimate=pl.CostEstimate(
            flops=flops, transcendentals=0, bytes_accessed=bytes_accessed),
    )(x_r, fcw, fcb, w0, b0, w1, b1, w2, b2)

    return out_padded[:B, :NUM_OUT_FEATURES]


def init_params(key, in_channels):
    """Deterministic f32 parameter init matching the module's layer shapes.

    PyTorch nn.Linear stores weight as [out, in]; we keep [in, out] so the
    kernel computes y = x @ W + b directly.
    """
    ks = jax.random.split(key, 8)

    def lin(kw, kb, fan_in, fan_out):
        scale = 1.0 / jnp.sqrt(jnp.float32(fan_in))
        w = jax.random.uniform(kw, (fan_in, fan_out), jnp.float32, -scale, scale)
        b = jax.random.uniform(kb, (1, fan_out), jnp.float32, -scale, scale)
        return w, b

    fcw, fcb = lin(ks[0], ks[1], in_channels, FEAT)        # stand-in backbone fc
    w0t, b0 = lin(ks[2], ks[3], FEAT, H0)                  # Linear0
    w1t, b1 = lin(ks[4], ks[5], H0, H1)                    # Linear1
    w2t, b2 = lin(ks[6], ks[7], H1, NUM_OUT_FEATURES)      # Linear2
    return (fcw, fcb, w0t, b0, w1t, b1, w2t, b2)


def prepare_params(params, h, w):
    """Pad / cast the f32 reference params into the TPU kernel layout.

    - folds the 1/(H*W) average-pool scale into the backbone projection,
    - zero-pads FEAT 1000 -> 1024, H1 64 -> 128 and head out 4 -> 128 (all
      numerically exact),
    - keeps the tiny backbone projection and all biases in f32, casts the big
      head matmul weights to bf16 (MXU-native).
    """
    fcw, fcb, w0t, b0, w1t, b1, w2t, b2 = params
    c = fcw.shape[0]

    fcw_p = (jnp.zeros((c, FEAT_PAD), jnp.float32)
             .at[:, :FEAT].set(fcw / float(h * w)))
    fcb_p = jnp.zeros((1, FEAT_PAD), jnp.float32).at[:, :FEAT].set(fcb)
    w0_p = jnp.zeros((FEAT_PAD, H0), jnp.float32).at[:FEAT, :].set(w0t)
    w1_p = jnp.zeros((H0, H1_PAD), jnp.float32).at[:, :H1].set(w1t)
    b1_p = jnp.zeros((1, H1_PAD), jnp.float32).at[:, :H1].set(b1)
    w2_p = (jnp.zeros((H1_PAD, OUT_PAD), jnp.float32)
            .at[:H1, :NUM_OUT_FEATURES].set(w2t))
    b2_p = jnp.zeros((1, OUT_PAD), jnp.float32).at[:, :NUM_OUT_FEATURES].set(b2)

    return (fcw_p, fcb_p,
            w0_p.astype(jnp.bfloat16), b0,
            w1_p.astype(jnp.bfloat16), b1_p,
            w2_p.astype(jnp.bfloat16), b2_p)


def reference_forward(x, params):
    """Pure-JAX f32 reference of the same computation (for a sanity check)."""
    fcw, fcb, w0t, b0, w1t, b1, w2t, b2 = params
    B, C, H, W = x.shape
    pooled = jnp.mean(x.reshape(B, C, H * W), axis=2)
    feat = pooled @ fcw + fcb
    h = jnp.maximum(feat @ w0t + b0, 0.0)
    h = jnp.maximum(h @ w1t + b1, 0.0)
    return h @ w2t + b2


if __name__ == "__main__":
    key = jax.random.PRNGKey(0)
    k_x, k_p = jax.random.split(key)

    B, C, H, W = 2, 3, 16, 16
    x = jax.random.normal(k_x, (B, C, H, W), dtype=jnp.float32)
    params = init_params(k_p, C)
    prepared = prepare_params(params, H, W)

    out = fine_classifier_v3(x, prepared)
    out = jax.block_until_ready(out)

    ref = reference_forward(x, params)
    assert out.shape == (B, NUM_OUT_FEATURES)
    # bf16 head weights/activation casts vs f32 reference -> relaxed tolerance
    assert jnp.allclose(out, ref, atol=3e-2, rtol=3e-2), "mismatch vs JAX reference"

    print("KERNEL_OK")
</pallas_src>

<mosaic_0001>
module attributes {stable_mosaic.version = 11 : i64} {
  func.func @_fine_classifier_kernel(%arg0: i32, %arg1: i32, %arg2: memref<8x3x256xf32, #tpu.memory_space<vmem>>, %arg3: memref<3x1024xf32, #tpu.memory_space<vmem>>, %arg4: memref<1x1024xf32, #tpu.memory_space<vmem>>, %arg5: memref<1024x512xbf16, #tpu.memory_space<vmem>>, %arg6: memref<1x512xf32, #tpu.memory_space<vmem>>, %arg7: memref<512x128xbf16, #tpu.memory_space<vmem>>, %arg8: memref<1x128xf32, #tpu.memory_space<vmem>>, %arg9: memref<128x128xbf16, #tpu.memory_space<vmem>>, %arg10: memref<1x128xf32, #tpu.memory_space<vmem>>, %arg11: memref<8x128xf32, #tpu.memory_space<vmem>>, %arg12: memref<8x3xf32, #tpu.memory_space<vmem>>) attributes {dimension_semantics = [#tpu.dimension_semantics<parallel>, #tpu.dimension_semantics<arbitrary>], iteration_bounds = array<i64: 1, 1>, scalar_prefetch = 0 : i64, scratch_operands = 1 : i64, tpu.core_type = #tpu.core_type<tc>, window_params = [{transform_indices = @transform_0, window_bounds = array<i64: 8, 3, 256>}, {pipeline_mode = #tpu.pipeline_mode<synchronous>, transform_indices = @transform_1, window_bounds = array<i64: 3, 1024>}, {pipeline_mode = #tpu.pipeline_mode<synchronous>, transform_indices = @transform_2, window_bounds = array<i64: 1, 1024>}, {pipeline_mode = #tpu.pipeline_mode<synchronous>, transform_indices = @transform_3, window_bounds = array<i64: 1024, 512>}, {pipeline_mode = #tpu.pipeline_mode<synchronous>, transform_indices = @transform_4, window_bounds = array<i64: 1, 512>}, {pipeline_mode = #tpu.pipeline_mode<synchronous>, transform_indices = @transform_5, window_bounds = array<i64: 512, 128>}, {pipeline_mode = #tpu.pipeline_mode<synchronous>, transform_indices = @transform_6, window_bounds = array<i64: 1, 128>}, {pipeline_mode = #tpu.pipeline_mode<synchronous>, transform_indices = @transform_7, window_bounds = array<i64: 128, 128>}, {pipeline_mode = #tpu.pipeline_mode<synchronous>, transform_indices = @transform_8, window_bounds = array<i64: 1, 128>}, {transform_indices = @transform_9, window_bounds = array<i64: 8, 128>}]} {
    %c0_i32 = arith.constant 0 : i32
    %0 = arith.cmpi eq, %arg1, %c0_i32 : i32
    %1 = arith.extui %0 : i1 to i32
    %c0_i32_0 = arith.constant 0 : i32
    %2 = arith.cmpi ne, %1, %c0_i32_0 : i32
    scf.if %2 {
      %cst_9 = arith.constant 0.000000e+00 : f32
      %11 = vector.broadcast %cst_9 : f32 to vector<8x3xf32>
      %c0_10 = arith.constant 0 : index
      %c0_11 = arith.constant 0 : index
      %12 = vector.load %arg12[%c0_10, %c0_11] : memref<8x3xf32, #tpu.memory_space<vmem>>, vector<8x3xf32>
      tpu.vector_store %arg12[%c0_10, %c0_11], %11 {strides = array<i32>} : memref<8x3xf32, #tpu.memory_space<vmem>>, vector<8x3xf32>,
    } else {
    }
    %c0 = arith.constant 0 : index
    %c0_1 = arith.constant 0 : index
    %3 = vector.load %arg12[%c0, %c0_1] : memref<8x3xf32, #tpu.memory_space<vmem>>, vector<8x3xf32>
    %c0_2 = arith.constant 0 : index
    %c0_3 = arith.constant 0 : index
    %c0_4 = arith.constant 0 : index
    %4 = vector.load %arg2[%c0_2, %c0_3, %c0_4] : memref<8x3x256xf32, #tpu.memory_space<vmem>>, vector<8x3x256xf32>
    %cst = arith.constant dense<0.000000e+00> : vector<8x3xf32>
    %5 = vector.multi_reduction <add>, %4, %cst [2] : vector<8x3x256xf32> to vector<8x3xf32>
    %6 = arith.addf %3, %5 : vector<8x3xf32>
    %c0_5 = arith.constant 0 : index
    %c0_6 = arith.constant 0 : index
    %7 = vector.load %arg12[%c0_5, %c0_6] : memref<8x3xf32, #tpu.memory_space<vmem>>, vector<8x3xf32>
    tpu.vector_store %arg12[%c0_5, %c0_6], %6 {strides = array<i32>} : memref<8x3xf32, #tpu.memory_space<vmem>>, vector<8x3xf32>,
    %c0_i32_7 = arith.constant 0 : i32
    %8 = arith.cmpi eq, %arg1, %c0_i32_7 : i32
    %9 = arith.extui %8 : i1 to i32
    %c0_i32_8 = arith.constant 0 : i32
    %10 = arith.cmpi ne, %9, %c0_i32_8 : i32
    scf.if %10 {
      %c0_9 = arith.constant 0 : index
      %c0_10 = arith.constant 0 : index
      %11 = vector.load %arg12[%c0_9, %c0_10] : memref<8x3xf32, #tpu.memory_space<vmem>>, vector<8x3xf32>
      %c0_11 = arith.constant 0 : index
      %c0_12 = arith.constant 0 : index
      %12 = vector.load %arg4[%c0_11, %c0_12] : memref<1x1024xf32, #tpu.memory_space<vmem>>, vector<1x1024xf32>
      %13 = vector.shape_cast %12 : vector<1x1024xf32> to vector<1x1024xf32>
      %14 = vector.broadcast %13 : vector<1x1024xf32> to vector<8x1024xf32>
      %15 = vector.extract_strided_slice %11 {offsets = [0, 0], sizes = [8, 1], strides = [1, 1]} : vector<8x3xf32> to vector<8x1xf32>
      %c0_13 = arith.constant 0 : index
      %c0_14 = arith.constant 0 : index
      %16 = vector.load %arg3[%c0_13, %c0_14] : memref<3x1024xf32, #tpu.memory_space<vmem>>, vector<1x1024xf32>
      %17 = vector.broadcast %15 : vector<8x1xf32> to vector<8x1024xf32>
      %18 = vector.broadcast %16 : vector<1x1024xf32> to vector<8x1024xf32>
      %19 = arith.mulf %17, %18 : vector<8x1024xf32>
      %20 = arith.addf %14, %19 : vector<8x1024xf32>
      %21 = vector.extract_strided_slice %11 {offsets = [0, 1], sizes = [8, 1], strides = [1, 1]} : vector<8x3xf32> to vector<8x1xf32>
      %c1 = arith.constant 1 : index
      %c0_15 = arith.constant 0 : index
      %22 = vector.load %arg3[%c1, %c0_15] : memref<3x1024xf32, #tpu.memory_space<vmem>>, vector<1x1024xf32>
      %23 = vector.broadcast %21 : vector<8x1xf32> to vector<8x1024xf32>
      %24 = vector.broadcast %22 : vector<1x1024xf32> to vector<8x1024xf32>
      %25 = arith.mulf %23, %24 : vector<8x1024xf32>
      %26 = arith.addf %20, %25 : vector<8x1024xf32>
      %27 = vector.extract_strided_slice %11 {offsets = [0, 2], sizes = [8, 1], strides = [1, 1]} : vector<8x3xf32> to vector<8x1xf32>
      %c2 = arith.constant 2 : index
      %c0_16 = arith.constant 0 : index
      %28 = vector.load %arg3[%c2, %c0_16] : memref<3x1024xf32, #tpu.memory_space<vmem>>, vector<1x1024xf32>
      %29 = vector.broadcast %27 : vector<8x1xf32> to vector<8x1024xf32>
      %30 = vector.broadcast %28 : vector<1x1024xf32> to vector<8x1024xf32>
      %31 = arith.mulf %29, %30 : vector<8x1024xf32>
      %32 = arith.addf %26, %31 : vector<8x1024xf32>
      %33 = arith.truncf %32 : vector<8x1024xf32> to vector<8x1024xbf16>
      %c0_17 = arith.constant 0 : index
      %c0_18 = arith.constant 0 : index
      %34 = vector.load %arg5[%c0_17, %c0_18] : memref<1024x512xbf16, #tpu.memory_space<vmem>>, vector<1024x512xbf16>
      %cst_19 = arith.constant dense<0.000000e+00> : vector<8x512xf32>
      %35 = tpu.matmul %33, %34, %cst_19 {dimension_numbers = #tpu.dot_dimension_numbers<[1], [0], [0], [1], [0, 0, 1, 1], [], []>} : vector<8x1024xbf16>, vector<1024x512xbf16>, vector<8x512xf32> -> vector<8x512xf32>
      %c0_20 = arith.constant 0 : index
      %c0_21 = arith.constant 0 : index
      %36 = vector.load %arg6[%c0_20, %c0_21] : memref<1x512xf32, #tpu.memory_space<vmem>>, vector<1x512xf32>
      %37 = vector.broadcast %36 : vector<1x512xf32> to vector<8x512xf32>
      %38 = arith.addf %35, %37 : vector<8x512xf32>
      %cst_22 = arith.constant 0.000000e+00 : f32
      %39 = vector.broadcast %cst_22 : f32 to vector<8x512xf32>
      %40 = arith.maximumf %38, %39 : vector<8x512xf32>
      %41 = arith.truncf %40 : vector<8x512xf32> to vector<8x512xbf16>
      %c0_23 = arith.constant 0 : index
      %c0_24 = arith.constant 0 : index
      %42 = vector.load %arg7[%c0_23, %c0_24] : memref<512x128xbf16, #tpu.memory_space<vmem>>, vector<512x128xbf16>
      %cst_25 = arith.constant dense<0.000000e+00> : vector<8x128xf32>
      %43 = tpu.matmul %41, %42, %cst_25 {dimension_numbers = #tpu.dot_dimension_numbers<[1], [0], [0], [1], [0, 0, 1, 1], [], []>} : vector<8x512xbf16>, vector<512x128xbf16>, vector<8x128xf32> -> vector<8x128xf32>
      %c0_26 = arith.constant 0 : index
      %c0_27 = arith.constant 0 : index
      %44 = vector.load %arg8[%c0_26, %c0_27] : memref<1x128xf32, #tpu.memory_space<vmem>>, vector<1x128xf32>
      %45 = vector.broadcast %44 : vector<1x128xf32> to vector<8x128xf32>
      %46 = arith.addf %43, %45 : vector<8x128xf32>
      %cst_28 = arith.constant 0.000000e+00 : f32
      %47 = vector.broadcast %cst_28 : f32 to vector<8x128xf32>
      %48 = arith.maximumf %46, %47 : vector<8x128xf32>
      %49 = arith.truncf %48 : vector<8x128xf32> to vector<8x128xbf16>
      %c0_29 = arith.constant 0 : index
      %c0_30 = arith.constant 0 : index
      %50 = vector.load %arg9[%c0_29, %c0_30] : memref<128x128xbf16, #tpu.memory_space<vmem>>, vector<128x128xbf16>
      %cst_31 = arith.constant dense<0.000000e+00> : vector<8x128xf32>
      %51 = tpu.matmul %49, %50, %cst_31 {dimension_numbers = #tpu.dot_dimension_numbers<[1], [0], [0], [1], [0, 0, 1, 1], [], []>} : vector<8x128xbf16>, vector<128x128xbf16>, vector<8x128xf32> -> vector<8x128xf32>
      %c0_32 = arith.constant 0 : index
      %c0_33 = arith.constant 0 : index
      %52 = vector.load %arg10[%c0_32, %c0_33] : memref<1x128xf32, #tpu.memory_space<vmem>>, vector<1x128xf32>
      %53 = vector.broadcast %52 : vector<1x128xf32> to vector<8x128xf32>
      %54 = arith.addf %51, %53 : vector<8x128xf32>
      %c0_34 = arith.constant 0 : index
      %c0_35 = arith.constant 0 : index
      %55 = vector.load %arg11[%c0_34, %c0_35] : memref<8x128xf32, #tpu.memory_space<vmem>>, vector<8x128xf32>
      tpu.vector_store %arg11[%c0_34, %c0_35], %54 {strides = array<i32>} : memref<8x128xf32, #tpu.memory_space<vmem>>, vector<8x128xf32>,
    } else {
    }
    return
  }
  func.func @transform_0(%arg0: i32, %arg1: i32) -> (i32, i32, i32) {
    %c0_i32 = arith.constant 0 : i32
    %c0_i32_0 = arith.constant 0 : i32
    return %arg0, %c0_i32, %arg1 : i32, i32, i32
  }
  func.func @transform_1(%arg0: i32, %arg1: i32) -> (i32, i32) {
    %c0_i32 = arith.constant 0 : i32
    %c0_i32_0 = arith.constant 0 : i32
    %c0_i32_1 = arith.constant 0 : i32
    return %c0_i32, %c0_i32_0 : i32, i32
  }
  func.func @transform_2(%arg0: i32, %arg1: i32) -> (i32, i32) {
    %c0_i32 = arith.constant 0 : i32
    %c0_i32_0 = arith.constant 0 : i32
    %c0_i32_1 = arith.constant 0 : i32
    return %c0_i32, %c0_i32_0 : i32, i32
  }
  func.func @transform_3(%arg0: i32, %arg1: i32) -> (i32, i32) {
    %c0_i32 = arith.constant 0 : i32
    %c0_i32_0 = arith.constant 0 : i32
    %c0_i32_1 = arith.constant 0 : i32
    return %c0_i32, %c0_i32_0 : i32, i32
  }
  func.func @transform_4(%arg0: i32, %arg1: i32) -> (i32, i32) {
    %c0_i32 = arith.constant 0 : i32
    %c0_i32_0 = arith.constant 0 : i32
    %c0_i32_1 = arith.constant 0 : i32
    return %c0_i32, %c0_i32_0 : i32, i32
  }
  func.func @transform_5(%arg0: i32, %arg1: i32) -> (i32, i32) {
    %c0_i32 = arith.constant 0 : i32
    %c0_i32_0 = arith.constant 0 : i32
    %c0_i32_1 = arith.constant 0 : i32
    return %c0_i32, %c0_i32_0 : i32, i32
  }
  func.func @transform_6(%arg0: i32, %arg1: i32) -> (i32, i32) {
    %c0_i32 = arith.constant 0 : i32
    %c0_i32_0 = arith.constant 0 : i32
    %c0_i32_1 = arith.constant 0 : i32
    return %c0_i32, %c0_i32_0 : i32, i32
  }
  func.func @transform_7(%arg0: i32, %arg1: i32) -> (i32, i32) {
    %c0_i32 = arith.constant 0 : i32
    %c0_i32_0 = arith.constant 0 : i32
    %c0_i32_1 = arith.constant 0 : i32
    return %c0_i32, %c0_i32_0 : i32, i32
  }
  func.func @transform_8(%arg0: i32, %arg1: i32) -> (i32, i32) {
    %c0_i32 = arith.constant 0 : i32
    %c0_i32_0 = arith.constant 0 : i32
    %c0_i32_1 = arith.constant 0 : i32
    return %c0_i32, %c0_i32_0 : i32, i32
  }
  func.func @transform_9(%arg0: i32, %arg1: i32) -> (i32, i32) {
    %c0_i32 = arith.constant 0 : i32
    %c0_i32_0 = arith.constant 0 : i32
    return %arg0, %c0_i32 : i32, i32
  }
}

</mosaic_0001>

<bundles_post_ra>
// kernel: tpu_custom_call.1
= control target key start
LH: loop header
LB: loop body
LE: loop exit
PB: predicated region body
PF: predicated region fallthrough
CT: control target
= control target key end

     0   :  { %14 = vsyncpa [#allocation4], 0  ;;  %s4062_s0 = inlined_call_operand.vmem [shape: f32[2,3,256], index: 0, kind: input, shape index: {}]   ;;  %s4063_s1 = inlined_call_operand.hbm [shape: f32[3,1024], index: 1, kind: input, shape index: {}]   ;;  %s4064_s2 = inlined_call_operand.vmem [shape: f32[1,1024], index: 2, kind: input, shape index: {}]   ;;  %s4065_s3 = inlined_call_operand.hbm [shape: bf16[1024,512], index: 3, kind: input, shape index: {}]   ;;  %s4066_s4 = inlined_call_operand.vmem [shape: f32[1,512], index: 4, kind: input, shape index: {}]   ;;  %s4067_s5 = inlined_call_operand.hbm [shape: bf16[512,128], index: 5, kind: input, shape index: {}]   ;;  %s4068_s6 = inlined_call_operand.vmem [shape: f32[1,128], index: 6, kind: input, shape index: {}]   ;;  %s4069_s7 = inlined_call_operand.hbm [shape: bf16[128,128], index: 7, kind: input, shape index: {}]   ;;  %s4070_s8 = inlined_call_operand.vmem [shape: f32[1,128], index: 8, kind: input, shape index: {}]   ;;  %s4071_s9 = inlined_call_operand.hbm [shape: f32[8,128], index: 9, kind: output, shape index: {}]  }
   0x1   :  { %15 = vsyncpa [#allocation7], 0 }
   0x2   :  { %16 = vsyncpa [#allocation10], 0 }
   0x3   :  { %17 = vsyncpa [#allocation5], 0  ;;  %s3767_s30 = smov [#allocation6]  }
   0x4   :  { %s37_s10 = sshll.u32 %s3767_s30, 4  ;;  %s38_s10 = int_to_ptr.vmem [resolvable:$true] %s37_s10 }
   0x5   :  { %s3667_s11 = scalar_lea.vmem %s38_s10, 32768  ;;  %p3672_p1 = scmp.lt.s32.totalorder %s38_s10, %s38_s10 }
   0x6   :  { %p3668_p0 = scmp.ne.s32.totalorder %s38_s10, %s3667_s11  ;;  %p3673_p2 = scmp.lt.s32.totalorder %s3667_s11, %s3667_s11 }
   0x8   :  { %p3674_p3 = por %p3673_p2, %p3672_p1 }
   0xa   :  { %p3675_p4 = pnand %p3674_p3, %p3668_p0 }
   0xc   :  { %3678 = shalt.err (!%p3675_p4)
}
   0xd   :  { %s3768_s12 = smov 256   ;;  %s3769_s13 = smov 16  }
   0xe   :  { %43 = dma.hbm_to_vmem [thread:$0]  %s4065_s3, 32768, %s38_s10, [#allocation7], %s3768_s12, %s3768_s12, %s3769_s13  }
   0xf   :  { %s3770_s16 = smov [#allocation3]   ;;  %s3771_s18 = smov [#allocation8]  }
  0x10   :  { %s26_s17 = sshll.u32 %s3770_s16, 4  ;;  %s51_s19 = sshll.u32 %s3771_s18, 4  ;;  %s27_s17 = int_to_ptr.vmem [resolvable:$true] %s26_s17  ;;  %s52_s19 = int_to_ptr.vmem [resolvable:$true] %s51_s19 }
  0x11   :  { %s3687_s20 = scalar_lea.vmem %s27_s17, 512  ;;  %p3692_p6 = scmp.lt.s32.totalorder %s27_s17, %s27_s17 }
  0x12   :  { %p3688_p5 = scmp.ne.s32.totalorder %s27_s17, %s3687_s20  ;;  %p3693_p7 = scmp.lt.s32.totalorder %s3687_s20, %s3687_s20 }
  0x14   :  { %p3694_p8 = por %p3693_p7, %p3692_p6 }
  0x16   :  { %p3695_p9 = pnand %p3694_p8, %p3688_p5 }
  0x18   :  { %3698 = shalt.err (!%p3695_p9)
}
  0x19   :  { %29 = dma.hbm_to_vmem [thread:$0]  %s4063_s1, 512, %s27_s17, [#allocation4]  }
  0x1a   :  { %s3707_s23 = scalar_lea.vmem %s52_s19, 4096  ;;  %p3712_p11 = scmp.lt.s32.totalorder %s52_s19, %s52_s19 }
  0x1b   :  { %p3708_p10 = scmp.ne.s32.totalorder %s52_s19, %s3707_s23  ;;  %p3713_p12 = scmp.lt.s32.totalorder %s3707_s23, %s3707_s23 }
  0x1d   :  { %p3714_p13 = por %p3713_p12, %p3712_p11 }
  0x1f   :  { %p3715_p0 = pnand %p3714_p13, %p3708_p10 }
  0x21   :  { %3718 = shalt.err (!%p3715_p0)
}
  0x22   :  { %s3772_s3 = smov 64   ;;  %s3773_s24 = smov 4  }
  0x23   :  { %57 = dma.hbm_to_vmem [thread:$0]  %s4067_s5, 4096, %s52_s19, [#allocation7], %s3772_s3, %s3772_s3, %s3773_s24  }
  0x24   :  { %s3774_s27 = smov [#allocation9]  }
  0x25   :  { %s65_s28 = sshll.u32 %s3774_s27, 4  ;;  %s66_s28 = int_to_ptr.vmem [resolvable:$true] %s65_s28 }
  0x26   :  { %s3727_s29 = scalar_lea.vmem %s66_s28, 1024  ;;  %p3732_p2 = scmp.lt.s32.totalorder %s66_s28, %s66_s28 }
  0x27   :  { %p3728_p1 = scmp.ne.s32.totalorder %s66_s28, %s3727_s29  ;;  %p3733_p3 = scmp.lt.s32.totalorder %s3727_s29, %s3727_s29 }
  0x29   :  { %p3734_p4 = por %p3733_p3, %p3732_p2 }
  0x2b   :  { %p3735_p5 = pnand %p3734_p4, %p3728_p1 }
  0x2d   :  { %3738 = shalt.err (!%p3735_p5)
}
  0x2e   :  { %71 = dma.hbm_to_vmem [thread:$0]  %s4069_s7, 1024, %s66_s28, [#allocation10], %s3772_s3, %s3772_s3, %s3773_s24  }
  0x2f   :  { %3759 = dma.done.wait [#allocation4], 512  }
  0x30   :  { %3760 = vsyncadd [#allocation4], 4294966784 }
  0x31   :  { %3761 = dma.done.wait [#allocation7], 36864  }
  0x32   :  { %3762 = vsyncadd [#allocation7], 4294930432 }
  0x33   :  { %3763 = dma.done.wait [#allocation10], 1024  }
  0x34   :  { %3764 = vsyncadd [#allocation10], 4294966272  ;;  %vm126_vm0 = vcmask 1042432   ;;  %v94_v0 = vld [vmem:[%s4062_s0] sm:$0x77]  ;;  %vm91_vm1 = vcmask 23552  }
  0x35   :  { %v96_v1 = vld [vmem:[%s4062_s0 + $0x10] sm:$0x77]  ;;  %v95_v2 = vld [vmem:[%s4062_s0 + $0x8] sm:$0x77]  ;;  %v110_v3 = vcombine.high %v94_v0, %v94_v0  ;;  %v127_v4 = vsel %vm126_vm0, %v94_v0, 0.0  ;;  %v3775_v40 = vmov 0.0  }
  0x36   :  { %v112_v5 = vcombine.high %v96_v1, %v96_v1  ;;  %v137_v6 = vsel %vm126_vm0, %v96_v1, 0.0  ;;  %v97_v7 = vld [vmem:[%s4062_s0 + $0x18] sm:$0x77]  ;;  %v98_v8 = vld [vmem:[%s4062_s0 + $0x20] sm:$0x77]  ;;  %v111_v9 = vcombine.high %v95_v2, %v95_v2  ;;  %v132_v10 = vsel %vm126_vm0, %v95_v2, 0.0 }
  0x37   :  { %v113_v11 = vcombine.high %v97_v7, %v97_v7  ;;  %v99_v12 = vld [vmem:[%s4062_s0 + $0x28] sm:$0x77]  ;;  %v100_v13 = vld [vmem:[%s4062_s0 + $0x30] sm:$0x77]  ;;  %v128_v14 = vsel %vm126_vm0, %v110_v3, 0.0  ;;  %v142_v16 = vsel %vm126_vm0, %v97_v7, 0.0  ;;  %v114_v17 = vcombine.high %v98_v8, %v98_v8 }
  0x38   :  { %v138_v15 = vsel %vm126_vm0, %v112_v5, 0.0  ;;  %v101_v18 = vld [vmem:[%s4062_s0 + $0x38] sm:$0x77]  ;;  %v129_v19 = vadd.f32 %v128_v14, %v127_v4  ;;  %v133_v21 = vsel %vm126_vm0, %v111_v9, 0.0  ;;  %v115_v23 = vcombine.high %v99_v12, %v99_v12  ;;  %92 = vst.msk [vmem:[#allocation2] sm:$0xff] %vm91_vm1, %v3775_v40  ;;  %s3780_s28 = smov [#allocation11]  }
  0x39   :  { %v139_v20 = vadd.f32 %v138_v15, %v137_v6  ;;  %v143_v22 = vsel %vm126_vm0, %v113_v11, 0.0  ;;  %v134_v24 = vadd.f32 %v133_v21, %v132_v10  ;;  %v147_v26 = vsel %vm126_vm0, %v98_v8, 0.0  ;;  %v3235_v43 = vld [vmem:[#allocation6 + $0xe4] ss:$16 sps:$4 sm:$0xff]   ;;  %v3239_v45 = vld [vmem:[#allocation6 + $0xe0] ss:$16 sps:$4 sm:$0xff]  }
  0x3a   :  { %130 = vadd.xlane.f32.xlu0 %v129_v19  ;;  %v144_v25 = vadd.f32 %v143_v22, %v142_v16  ;;  %v148_v27 = vsel %vm126_vm0, %v114_v17, 0.0  ;;  %v152_v28 = vsel %vm126_vm0, %v99_v12, 0.0  ;;  %v153_v29 = vsel %vm126_vm0, %v115_v23, 0.0  ;;  %v3237_v44 = vld [vmem:[#allocation6 + $0x2e4] ss:$16 sps:$4 sm:$0xff]   ;;  %2028 = vmatprep.subr.bf16.mxu0 %v3235_v43  ;;  %s2827_s29 = sshll.u32 %s3780_s28, 4  ;;  %s2828_s29 = int_to_ptr.vmem [resolvable:$true] %s2827_s29 }
  0x3b   :  { %140 = vadd.xlane.f32.xlu1 %v139_v20  ;;  %v116_v30 = vcombine.high %v100_v13, %v100_v13  ;;  %v117_v31 = vcombine.high %v101_v18, %v101_v18  ;;  %v149_v32 = vadd.f32 %v148_v27, %v147_v26  ;;  %v154_v33 = vadd.f32 %v153_v29, %v152_v28  ;;  %v3240_v46 = vld [vmem:[#allocation6 + $0x2e0] ss:$16 sps:$4 sm:$0xff]   ;;  %v3241_v47 = vld [vmem:[#allocation6 + $0xc4] ss:$16 sps:$4 sm:$0xff]   ;;  %p3744_p7 = scmp.lt.s32.totalorder %s2828_s29, %s2828_s29 }
  0x3c   :  { %v157_v34 = vsel %vm126_vm0, %v100_v13, 0.0  ;;  %v162_v36 = vsel %vm126_vm0, %v101_v18, 0.0  ;;  %v3776_v41 = vmov 1   ;;  %v3777_v42 = vmov 0   ;;  %v3243_v48 = vld [vmem:[#allocation6 + $0x2c4] ss:$16 sps:$4 sm:$0xff]   ;;  %2069 = vmatprep.subr.bf16.mxu1 %v3237_v44  ;;  %2029 = vmatpush1.bf16.msra.mxu0 %v3239_v45 }
  0x3d   :  { %v158_v35 = vsel %vm126_vm0, %v116_v30, 0.0  ;;  %v163_v37 = vsel %vm126_vm0, %v117_v31, 0.0  ;;  %3224 = vset.pattern.permute.xlu1 %v3776_v41  ;;  %3223 = vset.pattern.permute.xlu0 %v3777_v42  ;;  %v3245_v49 = vld [vmem:[#allocation6 + $0xc0] ss:$16 sps:$4 sm:$0xff]   ;;  %v3247_v51 = vld [vmem:[#allocation6 + $0xa4] ss:$16 sps:$4 sm:$0xff]  }
  0x3e   :  { %135 = vadd.xlane.f32.xlu0 %v134_v24  ;;  %v159_v38 = vadd.f32 %v158_v35, %v157_v34  ;;  %v164_v39 = vadd.f32 %v163_v37, %v162_v36  ;;  %2070 = vmatpush1.bf16.msra.mxu1 %v3240_v46  ;;  %v3246_v50 = vld [vmem:[#allocation6 + $0x2c0] ss:$16 sps:$4 sm:$0xff]   ;;  %v3249_v52 = vld [vmem:[#allocation6 + $0x2a4] ss:$16 sps:$4 sm:$0xff]   ;;  %vm209_vm2 = vcmask 1041409   ;;  %vm211_vm3 = vcmask 1042434  }
  0x3f   :  { %145 = vadd.xlane.f32.xlu1 %v144_v25  ;;  %2030 = vmatprep.subr.bf16.mxu0 %v3241_v47  ;;  %v3251_v53 = vld [vmem:[#allocation6 + $0xa0] ss:$16 sps:$4 sm:$0xff]   ;;  %v3253_v55 = vld [vmem:[#allocation6 + $0x84] ss:$16 sps:$4 sm:$0xff]   ;;  %vm213_vm4 = vcmask 1043459   ;;  %vm215_vm5 = vcmask 1044484  }
  0x40   :  { %2071 = vmatprep.subr.bf16.mxu1 %v3243_v48  ;;  %2031 = vmatpush1.bf16.msra.mxu0 %v3245_v49  ;;  %v3252_v54 = vld [vmem:[#allocation6 + $0x2a0] ss:$16 sps:$4 sm:$0xff]   ;;  %v3255_v56 = vld [vmem:[#allocation6 + $0x284] ss:$16 sps:$4 sm:$0xff]   ;;  %vm217_vm6 = vcmask 1045509   ;;  %vm219_vm7 = vcmask 1046534  }
  0x41   :  { %2032 = vmatprep.subr.bf16.mxu0 %v3247_v51  ;;  %v3257_v57 = vld [vmem:[#allocation6 + $0x80] ss:$16 sps:$4 sm:$0xff]   ;;  %v3259_v59 = vld [vmem:[#allocation6 + $0x64] ss:$16 sps:$4 sm:$0xff]   ;;  %vm221_vm8 = vcmask 1047559   ;;  %vm3779_vm9 = vmmov 0  }
  0x42   :  { %150 = vadd.xlane.f32.xlu0 %v149_v32  ;;  %2072 = vmatpush1.bf16.msra.mxu1 %v3246_v50  ;;  %v3258_v58 = vld [vmem:[#allocation6 + $0x280] ss:$16 sps:$4 sm:$0xff]   ;;  %v3261_v60 = vld [vmem:[#allocation6 + $0x264] ss:$16 sps:$4 sm:$0xff]  }
  0x43   :  { %155 = vadd.xlane.f32.xlu1 %v154_v33  ;;  %2073 = vmatprep.subr.bf16.mxu1 %v3249_v52  ;;  %v3263_v61 = vld [vmem:[#allocation6 + $0x60] ss:$16 sps:$4 sm:$0xff]   ;;  %v3265_v63 = vld [vmem:[#allocation6 + $0x44] ss:$16 sps:$4 sm:$0xff]   ;;  %v175_v33 = vlaneseq }
  0x44   :  { %2033 = vmatpush1.bf16.msra.mxu0 %v3251_v53  ;;  %v3264_v62 = vld [vmem:[#allocation6 + $0x260] ss:$16 sps:$4 sm:$0xff]   ;;  %v3267_v0 = vld [vmem:[#allocation6 + $0x244] ss:$16 sps:$4 sm:$0xff]  }
  0x45   :  { %2034 = vmatprep.subr.bf16.mxu0 %v3253_v55  ;;  %v3269_v1 = vld [vmem:[#allocation6 + $0x40] ss:$16 sps:$4 sm:$0xff]   ;;  %v3271_v3 = vld [vmem:[#allocation6 + $0x24] ss:$16 sps:$4 sm:$0xff]   ;;  %v176_v34 = vand.u32 127, %v175_v33  ;;  %v3885_v35 = vshrl.u32 %v175_v33, 7 }
  0x46   :  { %160 = vadd.xlane.f32.xlu0 %v159_v38  ;;  %2074 = vmatpush1.bf16.msra.mxu1 %v3252_v54  ;;  %v3270_v2 = vld [vmem:[#allocation6 + $0x240] ss:$16 sps:$4 sm:$0xff]   ;;  %v3273_v4 = vld [vmem:[#allocation6 + $0x224] ss:$16 sps:$4 sm:$0xff]  }
  0x47   :  { %165 = vadd.xlane.f32.xlu1 %v164_v39  ;;  %2075 = vmatprep.subr.bf16.mxu1 %v3255_v56  ;;  %v3275_v5 = vld [vmem:[#allocation6 + $0x20] ss:$16 sps:$4 sm:$0xff]   ;;  %v3277_v7 = vld [vmem:[#allocation6 + $0x4] ss:$16 sps:$4 sm:$0xff]   ;;  %v179_v38 = vsub.s32 %v176_v34, %v3885_v35 }
  0x48   :  { %2035 = vmatpush1.bf16.msra.mxu0 %v3257_v57  ;;  %v3276_v6 = vld [vmem:[#allocation6 + $0x220] ss:$16 sps:$4 sm:$0xff]   ;;  %v3279_v8 = vld [vmem:[#allocation6 + $0x204] ss:$16 sps:$4 sm:$0xff]  }
  0x49   :  { %2036 = vmatprep.subr.bf16.mxu0 %v3259_v59  ;;  %v3281_v9 = vld [vmem:[#allocation6] ss:$16 sps:$4 sm:$0xff]   ;;  %v3283_v11 = vld [vmem:[#allocation6 + $0x1e4] ss:$16 sps:$4 sm:$0xff]   ;;  %v93_v59 = vld [vmem:[#allocation2] sm:$0xff] }
  0x4a   :  { %2076 = vmatpush1.bf16.msra.mxu1 %v3258_v58  ;;  %v3282_v10 = vld [vmem:[#allocation6 + $0x200] ss:$16 sps:$4 sm:$0xff]   ;;  %v3285_v12 = vld [vmem:[#allocation6 + $0x3e4] ss:$16 sps:$4 sm:$0xff]  }
  0x4b   :  { %2077 = vmatprep.subr.bf16.mxu1 %v3261_v60  ;;  %v3287_v13 = vld [vmem:[#allocation6 + $0x1e0] ss:$16 sps:$4 sm:$0xff]   ;;  %v3289_v15 = vld [vmem:[#allocation6 + $0x1c4] ss:$16 sps:$4 sm:$0xff]  }
  0x4c   :  { %2037 = vmatpush1.bf16.msra.mxu0 %v3263_v61  ;;  %v3288_v14 = vld [vmem:[#allocation6 + $0x3e0] ss:$16 sps:$4 sm:$0xff]   ;;  %v3291_v16 = vld [vmem:[#allocation6 + $0x3c4] ss:$16 sps:$4 sm:$0xff]  }
  0x4d   :  { %2038 = vmatprep.subr.bf16.mxu0 %v3265_v63  ;;  %v3293_v17 = vld [vmem:[#allocation6 + $0x1c0] ss:$16 sps:$4 sm:$0xff]   ;;  %v3295_v19 = vld [vmem:[#allocation6 + $0x1a4] ss:$16 sps:$4 sm:$0xff]  }
  0x4e   :  { %2078 = vmatpush1.bf16.msra.mxu1 %v3264_v62  ;;  %v3294_v18 = vld [vmem:[#allocation6 + $0x3c0] ss:$16 sps:$4 sm:$0xff]   ;;  %v3297_v20 = vld [vmem:[#allocation6 + $0x3a4] ss:$16 sps:$4 sm:$0xff]  }
  0x4f   :  { %2079 = vmatprep.subr.bf16.mxu1 %v3267_v0  ;;  %v3299_v21 = vld [vmem:[#allocation6 + $0x1a0] ss:$16 sps:$4 sm:$0xff]   ;;  %v3301_v23 = vld [vmem:[#allocation6 + $0x184] ss:$16 sps:$4 sm:$0xff]  }
  0x50   :  { %2039 = vmatpush1.bf16.msra.mxu0 %v3269_v1  ;;  %v3300_v22 = vld [vmem:[#allocation6 + $0x3a0] ss:$16 sps:$4 sm:$0xff]   ;;  %v3303_v24 = vld [vmem:[#allocation6 + $0x384] ss:$16 sps:$4 sm:$0xff]  }
  0x51   :  { %2040 = vmatprep.subr.bf16.mxu0 %v3271_v3  ;;  %v3305_v25 = vld [vmem:[#allocation6 + $0x180] ss:$16 sps:$4 sm:$0xff]   ;;  %v3307_v27 = vld [vmem:[#allocation6 + $0x164] ss:$16 sps:$4 sm:$0xff]  }
  0x52   :  { %2080 = vmatpush1.bf16.msra.mxu1 %v3270_v2  ;;  %v3306_v26 = vld [vmem:[#allocation6 + $0x380] ss:$16 sps:$4 sm:$0xff]   ;;  %v3309_v28 = vld [vmem:[#allocation6 + $0x364] ss:$16 sps:$4 sm:$0xff]  }
  0x53   :  { %2081 = vmatprep.subr.bf16.mxu1 %v3273_v4  ;;  %v3311_v29 = vld [vmem:[#allocation6 + $0x160] ss:$16 sps:$4 sm:$0xff]   ;;  %v3313_v31 = vld [vmem:[#allocation6 + $0x144] ss:$16 sps:$4 sm:$0xff]  }
  0x54   :  { %2041 = vmatpush1.bf16.msra.mxu0 %v3275_v5  ;;  %v3312_v30 = vld [vmem:[#allocation6 + $0x360] ss:$16 sps:$4 sm:$0xff]   ;;  %v3315_v32 = vld [vmem:[#allocation6 + $0x344] ss:$16 sps:$4 sm:$0xff]  }
  0x55   :  { %2042 = vmatprep.subr.bf16.mxu0 %v3277_v7  ;;  %v3317_v63 = vld [vmem:[#allocation6 + $0x140] ss:$16 sps:$4 sm:$0xff]   ;;  %v3319_v1 = vld [vmem:[#allocation6 + $0x124] ss:$16 sps:$4 sm:$0xff]  }
  0x56   :  { %2082 = vmatpush1.bf16.msra.mxu1 %v3276_v6  ;;  %v3318_v0 = vld [vmem:[#allocation6 + $0x340] ss:$16 sps:$4 sm:$0xff]   ;;  %v3321_v2 = vld [vmem:[#allocation6 + $0x324] ss:$16 sps:$4 sm:$0xff]  }
  0x57   :  { %2083 = vmatprep.subr.bf16.mxu1 %v3279_v8  ;;  %v3323_v3 = vld [vmem:[#allocation6 + $0x120] ss:$16 sps:$4 sm:$0xff]   ;;  %v3325_v6 = vld [vmem:[#allocation6 + $0x104] ss:$16 sps:$4 sm:$0xff]  }
  0x58   :  { %2043 = vmatpush1.bf16.msra.mxu0 %v3281_v9  ;;  %v3324_v4 = vld [vmem:[#allocation6 + $0x320] ss:$16 sps:$4 sm:$0xff]   ;;  %v3327_v7 = vld [vmem:[#allocation6 + $0x304] ss:$16 sps:$4 sm:$0xff]  }
  0x59   :  { %2044 = vmatprep.subr.bf16.mxu0 %v3283_v11  ;;  %v3329_v8 = vld [vmem:[#allocation6 + $0x100] ss:$16 sps:$4 sm:$0xff]   ;;  %v3333_v11 = vld [vmem:[#allocation6 + $0x4e4] ss:$16 sps:$4 sm:$0xff]  }
  0x5a   :  { %2084 = vmatpush1.bf16.msra.mxu1 %v3282_v10  ;;  %v3330_v9 = vld [vmem:[#allocation6 + $0x300] ss:$16 sps:$4 sm:$0xff]   ;;  %v3778_v10 = vmov 2  }
  0x5b   :  { %2085 = vmatprep.subr.bf16.mxu1 %v3285_v12  ;;  %v3336_v12 = vld [vmem:[#allocation6 + $0x6e4] ss:$16 sps:$4 sm:$0xff]  }
  0x5c   :  { %2045 = vmatpush2.bf16.msra.mxu0 %v3287_v13  ;;  %v3890_v13 = vsub.s32 1, %v3885_v35 }
  0x5d   :  { %2046 = vmatprep.subr.bf16.mxu0 %v3289_v15  ;;  %v3895_v15 = vld [vmem:[#allocation3] ss:$4 sm:$0xff] }
  0x5e   :  { %2086 = vmatpush2.bf16.msra.mxu1 %v3288_v14  ;;  %v3893_v14 = vsub.s32 3, %v3885_v35 }
  0x5f   :  { %2087 = vmatprep.subr.bf16.mxu1 %v3291_v16  ;;  %v3897_v16 = vld [vmem:[#allocation3 + $0x1] ss:$4 sm:$0xff] }
  0x60   :  { %2047 = vmatpush2.bf16.msra.mxu0 %v3293_v17  ;;  %v3900_v17 = vsub.s32 0, %v3885_v35 }
  0x61   :  { %2048 = vmatprep.subr.bf16.mxu0 %v3295_v19  ;;  %v3908_v19 = vld [vmem:[%s4064_s2] sm:$0xff] }
  0x62   :  { %2088 = vmatpush2.bf16.msra.mxu1 %v3294_v18  ;;  %v3903_v18 = vsub.s32 2, %v3885_v35  ;;  %v248_v33 = vrot.slane %v3908_v19, %v3893_v14  ;;  %v236_v34 = vrot.slane %v3908_v19, %v3900_v17 }
  0x63   :  { %2089 = vmatprep.subr.bf16.mxu1 %v3297_v20  ;;  %v287_v20 = vrot.slane %v3895_v15, %v3890_v13 }
  0x64   :  { %2049 = vmatpush2.bf16.msra.mxu0 %v3299_v21  ;;  %v350_v21 = vrot.slane %v3897_v16, %v3890_v13 }
  0x65   :  { %2050 = vmatprep.subr.bf16.mxu0 %v3301_v23  ;;  %v3917_v23 = vsub.s32 5, %v3885_v35 }
  0x66   :  { %2090 = vmatpush2.bf16.msra.mxu1 %v3300_v22  ;;  %v295_v22 = vrot.slane %v3895_v15, %v3893_v14 }
  0x67   :  { %2091 = vmatprep.subr.bf16.mxu1 %v3303_v24  ;;  %v3919_v24 = vld [vmem:[#allocation3 + $0x2] ss:$4 sm:$0xff] }
  0x68   :  { %2051 = vmatpush2.bf16.msra.mxu0 %v3305_v25  ;;  %v358_v25 = vrot.slane %v3897_v16, %v3893_v14 }
  0x69   :  { %2052 = vmatprep.subr.bf16.mxu0 %v3307_v27  ;;  %v346_v27 = vrot.slane %v3897_v16, %v3900_v17 }
  0x6a   :  { %2092 = vmatpush2.bf16.msra.mxu1 %v3306_v26  ;;  %v283_v26 = vrot.slane %v3895_v15, %v3900_v17 }
  0x6b   :  { %2093 = vmatprep.subr.bf16.mxu1 %v3309_v28  ;;  %v3928_v28 = vsub.s32 7, %v3885_v35 }
  0x6c   :  { %2053 = vmatpush2.bf16.msra.mxu0 %v3311_v29  ;;  %v240_v29 = vrot.slane %v3908_v19, %v3890_v13 }
  0x6d   :  { %2054 = vmatprep.subr.bf16.mxu0 %v3313_v31  ;;  %v354_v31 = vrot.slane %v3897_v16, %v3903_v18 }
  0x6e   :  { %2094 = vmatpush2.bf16.msra.mxu1 %v3312_v30  ;;  %v291_v30 = vrot.slane %v3895_v15, %v3903_v18 }
  0x6f   :  { %2095 = vmatprep.subr.bf16.mxu1 %v3315_v32  ;;  %v3937_v32 = vsub.s32 4, %v3885_v35 }
  0x70   :  { %2055 = vmatpush2.bf16.msra.mxu0 %v3317_v63 }
  0x71   :  { %2056 = vmatprep.subr.bf16.mxu0 %v3319_v1 }
  0x72   :  { %2096 = vmatpush2.bf16.msra.mxu1 %v3318_v0 }
  0x73   :  { %2097 = vmatprep.subr.bf16.mxu1 %v3321_v2 }
  0x74   :  { %2057 = vmatpush2.bf16.msra.mxu0 %v3323_v3 }
  0x75   :  { %2058 = vmatprep.subr.bf16.mxu0 %v3325_v6 }
  0x76   :  { %2098 = vmatpush2.bf16.msra.mxu1 %v3324_v4 }
  0x77   :  { %2099 = vmatprep.subr.bf16.mxu1 %v3327_v7 }
  0x78   :  { %2059 = vmatpush2.bf16.msra.mxu0 %v3329_v8 }
  0x79   :  { %2110 = vmatprep.subr.bf16.mxu0 %v3333_v11 }
  0x7a   :  { %2100 = vmatpush2.bf16.msra.mxu1 %v3330_v9 }
  0x7b   :  { %2151 = vmatprep.subr.bf16.mxu1 %v3336_v12 }
  0xc3   :  { %v131_v36 = vpop.xlane.xlu0 %130 }
  0xc4   :  { %v141_v37 = vpop.xlane.xlu1 %140  ;;  %v180_v42 = vrot.slane %v131_v36, %v179_v38  ;;  %v244_v36 = vrot.slane %v3908_v19, %v3903_v18 }
  0xc5   :  { %v188_v45 = vrot.slane %v141_v37, %v179_v38  ;;  %v3946_v37 = vsub.s32 6, %v3885_v35  ;;  %v264_v35 = vrot.slane %v3908_v19, %v3928_v28 }
  0xc7   :  { %v136_v39 = vpop.xlane.xlu0 %135 }
  0xc8   :  { %v146_v41 = vpop.xlane.xlu1 %145  ;;  %v184_v43 = vrot.slane %v136_v39, %v179_v38  ;;  %v256_v39 = vrot.slane %v3908_v19, %v3917_v23 }
  0xc9   :  { %v192_v44 = vrot.slane %v146_v41, %v179_v38  ;;  %v303_v41 = vrot.slane %v3895_v15, %v3917_v23 }
  0xca   :  { %v210_v46 = vsel %vm209_vm2, %v184_v43, %v180_v42  ;;  %v366_v42 = vrot.slane %v3897_v16, %v3917_v23  ;;  %v421_v43 = vrot.slane %v3919_v24, %v3893_v14 }
  0xcb   :  { %v212_v47 = vsel %vm211_vm3, %v188_v45, %v210_v46  ;;  %v151_v48 = vpop.xlane.xlu0 %150  ;;  %v311_v45 = vrot.slane %v3895_v15, %v3928_v28  ;;  %v417_v46 = vrot.slane %v3919_v24, %v3903_v18 }
  0xcc   :  { %v156_v49 = vpop.xlane.xlu1 %155  ;;  %v214_v50 = vsel %vm213_vm4, %v192_v44, %v212_v47  ;;  %v196_v51 = vrot.slane %v151_v48, %v179_v38  ;;  %v409_v44 = vrot.slane %v3919_v24, %v3900_v17  ;;  %v429_v47 = vrot.slane %v3919_v24, %v3917_v23 }
  0xcd   :  { %v200_v52 = vrot.slane %v156_v49, %v179_v38  ;;  %v374_v48 = vrot.slane %v3897_v16, %v3928_v28  ;;  %v299_v49 = vrot.slane %v3895_v15, %v3937_v32 }
  0xce   :  { %v216_v53 = vsel %vm215_vm5, %v196_v51, %v214_v50  ;;  %v437_v50 = vrot.slane %v3919_v24, %v3928_v28  ;;  %v252_v51 = vrot.slane %v3908_v19, %v3937_v32 }
  0xcf   :  { %v161_v54 = vpop.xlane.xlu0 %160  ;;  %v218_v58 = vsel %vm217_vm6, %v200_v52, %v216_v53  ;;  %v362_v52 = vrot.slane %v3897_v16, %v3937_v32  ;;  %v307_v53 = vrot.slane %v3895_v15, %v3946_v37 }
  0xd0   :  { %v166_v55 = vpop.xlane.xlu1 %165  ;;  %v204_v56 = vrot.slane %v161_v54, %v179_v38 }
  0xd1   :  { %v208_v57 = vrot.slane %v166_v55, %v179_v38  ;;  %v413_v38 = vrot.slane %v3919_v24, %v3890_v13 }
  0xd2   :  { %v220_v60 = vsel %vm219_vm7, %v204_v56, %v218_v58  ;;  %v425_v56 = vrot.slane %v3919_v24, %v3937_v32  ;;  %v370_v58 = vrot.slane %v3897_v16, %v3946_v37 }
  0xd3   :  { %v222_v61 = vsel %vm221_vm8, %v208_v57, %v220_v60  ;;  %v260_v57 = vrot.slane %v3908_v19, %v3946_v37  ;;  %v3351_v19 = vld [vmem:[#allocation6 + $0x484] ss:$16 sps:$4 sm:$0xff]  }
  0xd4   :  { %v224_v62 = vadd.f32 %v222_v61, %v93_v59  ;;  %v433_v59 = vrot.slane %v3919_v24, %v3946_v37  ;;  %v3354_v37 = vld [vmem:[#allocation6 + $0x684] ss:$16 sps:$4 sm:$0xff]  }
  0xd6   :  { %226 = vst.msk [vmem:[#allocation2] sm:$0xff] %vm91_vm1, %v224_v62 }
  0xdd   :  { %v230_v5 = vld [vmem:[#allocation2] sm:$0xff] }
  0xde   :  { %339 = vperm.xlu1 %3224, %v230_v5   ;;  %276 = vperm.xlu0 %3223, %v230_v5  }
  0xe2   :  { %3225 = vset.pattern.permute.xlu1 %v3778_v10  ;;  %3226 = vset.pattern.permute.xlu0 %v3778_v10 }
  0xe3   :  { %402 = vperm.xlu1 %3225, %v230_v5  }
 0x159   :  { %v340_v54 = vpop.permute.xlu1 %339  ;;  %v277_v55 = vpop.permute.xlu0 %276 }
 0x15a   :  { %v321_v60 = vmul.f32 %v287_v20, %v277_v55  ;;  %v384_v61 = vmul.f32 %v350_v21, %v340_v54  ;;  %v323_v62 = vmul.f32 %v295_v22, %v277_v55  ;;  %v386_v63 = vmul.f32 %v358_v25, %v340_v54 }
 0x15b   :  { %v320_v0 = vmul.f32 %v283_v26, %v277_v55  ;;  %v383_v1 = vmul.f32 %v346_v27, %v340_v54  ;;  %v322_v2 = vmul.f32 %v291_v30, %v277_v55  ;;  %v385_v3 = vmul.f32 %v354_v31, %v340_v54 }
 0x15c   :  { %v329_v4 = vadd.f32 %v321_v60, %v240_v29  ;;  %v331_v5 = vadd.f32 %v323_v62, %v248_v33  ;;  %v325_v6 = vmul.f32 %v303_v41, %v277_v55  ;;  %v388_v7 = vmul.f32 %v366_v42, %v340_v54 }
 0x15d   :  { %v328_v8 = vadd.f32 %v320_v0, %v236_v34  ;;  %v330_v9 = vadd.f32 %v322_v2, %v244_v36  ;;  %v327_v10 = vmul.f32 %v311_v45, %v277_v55  ;;  %v390_v11 = vmul.f32 %v374_v48, %v340_v54 }
 0x15e   :  { %v403_v12 = vpop.permute.xlu1 %402  ;;  %v392_v15 = vadd.f32 %v384_v61, %v329_v4  ;;  %v394_v16 = vadd.f32 %v386_v63, %v331_v5  ;;  %v333_v23 = vadd.f32 %v325_v6, %v256_v39  ;;  %v324_v20 = vmul.f32 %v299_v49, %v277_v55  ;;  %v3352_v5 = vld [vmem:[#allocation6 + $0x680] ss:$16 sps:$4 sm:$0xff]   ;;  %v3357_v6 = vld [vmem:[#allocation6 + $0x464] ss:$16 sps:$4 sm:$0xff]  }
 0x15f   :  { %v447_v21 = vmul.f32 %v413_v38, %v403_v12  ;;  %v449_v22 = vmul.f32 %v421_v43, %v403_v12  ;;  %v391_v24 = vadd.f32 %v383_v1, %v328_v8  ;;  %v446_v25 = vmul.f32 %v409_v44, %v403_v12  ;;  %v3331_v38 = vld [vmem:[#allocation6 + $0x4e0] ss:$16 sps:$4 sm:$0xff]  }
 0x160   :  { %v393_v26 = vadd.f32 %v385_v3, %v330_v9  ;;  %v448_v27 = vmul.f32 %v417_v46, %v403_v12  ;;  %v396_v28 = vadd.f32 %v388_v7, %v333_v23  ;;  %v451_v29 = vmul.f32 %v429_v47, %v403_v12  ;;  %v3334_v43 = vld [vmem:[#allocation6 + $0x6e0] ss:$16 sps:$4 sm:$0xff]   ;;  %v3339_v47 = vld [vmem:[#allocation6 + $0x4c4] ss:$16 sps:$4 sm:$0xff]  }
 0x161   :  { %v455_v30 = vadd.f32 %v447_v21, %v392_v15  ;;  %v457_v31 = vadd.f32 %v449_v22, %v394_v16  ;;  %v454_v32 = vadd.f32 %v446_v25, %v391_v24  ;;  %v335_v33 = vadd.f32 %v327_v10, %v264_v35  ;;  %v3340_v1 = vld [vmem:[#allocation6 + $0x6c0] ss:$16 sps:$4 sm:$0xff]   ;;  %v3360_v7 = vld [vmem:[#allocation6 + $0x664] ss:$16 sps:$4 sm:$0xff]  }
 0x162   :  { %v456_v34 = vadd.f32 %v448_v27, %v393_v26  ;;  %v459_v36 = vadd.f32 %v451_v29, %v396_v28  ;;  %v453_v41 = vmul.f32 %v437_v50, %v403_v12  ;;  %v332_v42 = vadd.f32 %v324_v20, %v252_v51  ;;  %v3342_v50 = vld [vmem:[#allocation6 + $0x6c4] ss:$16 sps:$4 sm:$0xff]   ;;  %v3346_v3 = vld [vmem:[#allocation6 + $0x6a0] ss:$16 sps:$4 sm:$0xff]  }
 0x163   :  { %v3988_v45 = vpack.c.bf16 %v455_v30, %v455_v30  ;;  %v3990_v39 = vpack.c.bf16 %v457_v31, %v457_v31  ;;  %v3992_v48 = vpack.c.bf16 %v454_v32, %v454_v32  ;;  %v398_v44 = vadd.f32 %v390_v11, %v335_v33  ;;  %v3355_v8 = vld [vmem:[#allocation6 + $0x460] ss:$16 sps:$4 sm:$0xff]   ;;  %v3363_v10 = vld [vmem:[#allocation6 + $0x444] ss:$16 sps:$4 sm:$0xff]  }
 0x164   :  { %v3994_v46 = vpack.c.bf16 %v456_v34, %v456_v34  ;;  %v387_v49 = vmul.f32 %v362_v52, %v340_v54  ;;  %v450_v60 = vmul.f32 %v425_v56, %v403_v12  ;;  %v326_v51 = vmul.f32 %v307_v53, %v277_v55  ;;  %v3337_v56 = vld [vmem:[#allocation6 + $0x4c0] ss:$16 sps:$4 sm:$0xff]   ;;  %v3345_v53 = vld [vmem:[#allocation6 + $0x4a4] ss:$16 sps:$4 sm:$0xff]  }
 0x165   :  { %2060 = vmatprep.mubr.bf16.mxu0 %v3988_v45  ;;  %2101 = vmatprep.mubr.bf16.mxu1 %v3990_v39  ;;  %v461_v35 = vadd.f32 %v453_v41, %v398_v44  ;;  %v389_v61 = vmul.f32 %v370_v58, %v340_v54  ;;  %v4000_v62 = vpack.c.bf16 %v459_v36, %v459_v36  ;;  %v3348_v54 = vld [vmem:[#allocation6 + $0x6a4] ss:$16 sps:$4 sm:$0xff]   ;;  %v3358_v9 = vld [vmem:[#allocation6 + $0x660] ss:$16 sps:$4 sm:$0xff]  }
 0x166   :  { %2061 = vmatmul.mubr.bf16.vlgmr.msra.gmra.mxu0 %v3992_v48  ;;  %2102 = vmatmul.mubr.bf16.vlgmr.msra.gmra.mxu1 %v3994_v46  ;;  %v395_v63 = vadd.f32 %v387_v49, %v332_v42  ;;  %v452_v0 = vmul.f32 %v433_v59, %v403_v12  ;;  %v334_v2 = vadd.f32 %v326_v51, %v260_v57  ;;  %v3343_v59 = vld [vmem:[#allocation6 + $0x4a0] ss:$16 sps:$4 sm:$0xff]   ;;  %v3366_v11 = vld [vmem:[#allocation6 + $0x644] ss:$16 sps:$4 sm:$0xff]  }
 0x167   :  { %2111 = vmatpush1.bf16.msra.mxu0 %v3331_v38  ;;  %2152 = vmatpush1.bf16.msra.mxu1 %v3334_v43  ;;  %v4002_v52 = vpack.c.bf16 %v461_v35, %v461_v35  ;;  %v3349_v57 = vld [vmem:[#allocation6 + $0x480] ss:$16 sps:$4 sm:$0xff]   ;;  %v3369_v16 = vld [vmem:[#allocation6 + $0x424] ss:$16 sps:$4 sm:$0xff]  }
 0x168   :  { %2142 = vmatprep.mubr.bf16.mxu0 %v4000_v62  ;;  %2112 = vmatprep.subr.bf16.mxu0 %v3339_v47  ;;  %v4008_v55 = vadd.f32 %v450_v60, %v395_v63  ;;  %v397_v58 = vadd.f32 %v389_v61, %v334_v2  ;;  %v3361_v12 = vld [vmem:[#allocation6 + $0x440] ss:$16 sps:$4 sm:$0xff]   ;;  %v3372_v23 = vld [vmem:[#allocation6 + $0x624] ss:$16 sps:$4 sm:$0xff]  }
 0x169   :  { %2183 = vmatprep.mubr.bf16.mxu1 %v4002_v52  ;;  %2153 = vmatprep.subr.bf16.mxu1 %v3342_v50  ;;  %v3364_v15 = vld [vmem:[#allocation6 + $0x640] ss:$16 sps:$4 sm:$0xff]   ;;  %v3375_v22 = vld [vmem:[#allocation6 + $0x404] ss:$16 sps:$4 sm:$0xff]  }
 0x16a   :  { %v4011_v4 = vadd.f32 %v452_v0, %v397_v58  ;;  %v3367_v20 = vld [vmem:[#allocation6 + $0x420] ss:$16 sps:$4 sm:$0xff]   ;;  %v3378_v24 = vld [vmem:[#allocation6 + $0x604] ss:$16 sps:$4 sm:$0xff]  }
 0x16b   :  { %2113 = vmatpush1.bf16.msra.mxu0 %v3337_v56  ;;  %2154 = vmatpush1.bf16.msra.mxu1 %v3340_v1  ;;  %v3370_v21 = vld [vmem:[#allocation6 + $0x620] ss:$16 sps:$4 sm:$0xff]   ;;  %v3381_v27 = vld [vmem:[#allocation6 + $0x5e4] ss:$16 sps:$4 sm:$0xff]  }
 0x16c   :  { %2114 = vmatprep.subr.bf16.mxu0 %v3345_v53  ;;  %2155 = vmatprep.subr.bf16.mxu1 %v3348_v54  ;;  %v3373_v25 = vld [vmem:[#allocation6 + $0x400] ss:$16 sps:$4 sm:$0xff]   ;;  %v3384_v28 = vld [vmem:[#allocation6 + $0x7e4] ss:$16 sps:$4 sm:$0xff]  }
 0x16d   :  { %v3376_v26 = vld [vmem:[#allocation6 + $0x600] ss:$16 sps:$4 sm:$0xff]   ;;  %v3387_v31 = vld [vmem:[#allocation6 + $0x5c4] ss:$16 sps:$4 sm:$0xff]  }
 0x16e   :  { %v3379_v29 = vld [vmem:[#allocation6 + $0x5e0] ss:$16 sps:$4 sm:$0xff]   ;;  %v3390_v32 = vld [vmem:[#allocation6 + $0x7c4] ss:$16 sps:$4 sm:$0xff]  }
 0x16f   :  { %2115 = vmatpush1.bf16.msra.mxu0 %v3343_v59  ;;  %2156 = vmatpush1.bf16.msra.mxu1 %v3346_v3  ;;  %v3382_v30 = vld [vmem:[#allocation6 + $0x7e0] ss:$16 sps:$4 sm:$0xff]   ;;  %v3393_v36 = vld [vmem:[#allocation6 + $0x5a4] ss:$16 sps:$4 sm:$0xff]  }
 0x170   :  { %2116 = vmatprep.subr.bf16.mxu0 %v3351_v19  ;;  %2157 = vmatprep.subr.bf16.mxu1 %v3354_v37  ;;  %v3385_v33 = vld [vmem:[#allocation6 + $0x5c0] ss:$16 sps:$4 sm:$0xff]   ;;  %v3396_v41 = vld [vmem:[#allocation6 + $0x7a4] ss:$16 sps:$4 sm:$0xff]   ;;  %v3429_v37 = vld [vmem:[#allocation6 + $0xec] ss:$16 sps:$4 sm:$0xff]  }
 0x171   :  { %v3388_v34 = vld [vmem:[#allocation6 + $0x7c0] ss:$16 sps:$4 sm:$0xff]   ;;  %v3399_v43 = vld [vmem:[#allocation6 + $0x584] ss:$16 sps:$4 sm:$0xff]  }
 0x172   :  { %v3391_v42 = vld [vmem:[#allocation6 + $0x5a0] ss:$16 sps:$4 sm:$0xff]   ;;  %v3402_v44 = vld [vmem:[#allocation6 + $0x784] ss:$16 sps:$4 sm:$0xff]  }
 0x173   :  { %2117 = vmatpush1.bf16.msra.mxu0 %v3349_v57  ;;  %2158 = vmatpush1.bf16.msra.mxu1 %v3352_v5  ;;  %v3394_v38 = vld [vmem:[#allocation6 + $0x7a0] ss:$16 sps:$4 sm:$0xff]   ;;  %v3405_v60 = vld [vmem:[#allocation6 + $0x564] ss:$16 sps:$4 sm:$0xff]   ;;  %v3432_v57 = vld [vmem:[#allocation6 + $0x2ec] ss:$16 sps:$4 sm:$0xff]  }
 0x174   :  { %2118 = vmatprep.subr.bf16.mxu0 %v3357_v6  ;;  %2159 = vmatprep.subr.bf16.mxu1 %v3360_v7  ;;  %v3397_v47 = vld [vmem:[#allocation6 + $0x580] ss:$16 sps:$4 sm:$0xff]   ;;  %v3408_v35 = vld [vmem:[#allocation6 + $0x764] ss:$16 sps:$4 sm:$0xff]   ;;  %v3427_v5 = vld [vmem:[#allocation6 + $0xe8] ss:$16 sps:$4 sm:$0xff]   ;;  %v4015_v6 = vpack.c.bf16 %v4008_v55, %v4008_v55  ;;  %v4019_v7 = vpack.c.bf16 %v4011_v4, %v4011_v4 }
 0x175   :  { %v3400_v49 = vld [vmem:[#allocation6 + $0x780] ss:$16 sps:$4 sm:$0xff]   ;;  %v3411_v61 = vld [vmem:[#allocation6 + $0x544] ss:$16 sps:$4 sm:$0xff]   ;;  %v3436_v55 = vld [vmem:[#allocation6 + $0x2c8] ss:$16 sps:$4 sm:$0xff]  }
 0x176   :  { %v3403_v50 = vld [vmem:[#allocation6 + $0x560] ss:$16 sps:$4 sm:$0xff]   ;;  %v3414_v63 = vld [vmem:[#allocation6 + $0x744] ss:$16 sps:$4 sm:$0xff]   ;;  %v3444_v4 = vld [vmem:[#allocation6 + $0x2ac] ss:$16 sps:$4 sm:$0xff]  }
 0x177   :  { %2119 = vmatpush1.bf16.msra.mxu0 %v3355_v8  ;;  %2160 = vmatpush1.bf16.msra.mxu1 %v3358_v9  ;;  %v3406_v51 = vld [vmem:[#allocation6 + $0x760] ss:$16 sps:$4 sm:$0xff]   ;;  %v3417_v1 = vld [vmem:[#allocation6 + $0x524] ss:$16 sps:$4 sm:$0xff]   ;;  %v3430_v8 = vld [vmem:[#allocation6 + $0x2e8] ss:$16 sps:$4 sm:$0xff]  }
 0x178   :  { %2120 = vmatprep.subr.bf16.mxu0 %v3363_v10  ;;  %2161 = vmatprep.subr.bf16.mxu1 %v3366_v11  ;;  %v3409_v0 = vld [vmem:[#allocation6 + $0x540] ss:$16 sps:$4 sm:$0xff]   ;;  %v3420_v2 = vld [vmem:[#allocation6 + $0x724] ss:$16 sps:$4 sm:$0xff]   ;;  %v3435_v9 = vld [vmem:[#allocation6 + $0xcc] ss:$16 sps:$4 sm:$0xff]  }
 0x179   :  { %v3412_v56 = vld [vmem:[#allocation6 + $0x740] ss:$16 sps:$4 sm:$0xff]   ;;  %v3423_v58 = vld [vmem:[#allocation6 + $0x504] ss:$16 sps:$4 sm:$0xff]   ;;  %v3438_v10 = vld [vmem:[#allocation6 + $0x2cc] ss:$16 sps:$4 sm:$0xff]  }
 0x17a   :  { %v3415_v53 = vld [vmem:[#allocation6 + $0x520] ss:$16 sps:$4 sm:$0xff]   ;;  %v3426_v59 = vld [vmem:[#allocation6 + $0x704] ss:$16 sps:$4 sm:$0xff]   ;;  %v3433_v11 = vld [vmem:[#allocation6 + $0xc8] ss:$16 sps:$4 sm:$0xff]  }
 0x17b   :  { %2121 = vmatpush1.bf16.msra.mxu0 %v3361_v12  ;;  %2162 = vmatpush1.bf16.msra.mxu1 %v3364_v15  ;;  %v3418_v54 = vld [vmem:[#allocation6 + $0x720] ss:$16 sps:$4 sm:$0xff]   ;;  %v3441_v12 = vld [vmem:[#allocation6 + $0xac] ss:$16 sps:$4 sm:$0xff]   ;;  %v3439_v15 = vld [vmem:[#allocation6 + $0xa8] ss:$16 sps:$4 sm:$0xff]  }
 0x17c   :  { %2122 = vmatprep.subr.bf16.mxu0 %v3369_v16  ;;  %2163 = vmatprep.subr.bf16.mxu1 %v3372_v23  ;;  %v3421_v3 = vld [vmem:[#allocation6 + $0x500] ss:$16 sps:$4 sm:$0xff]   ;;  %v3442_v16 = vld [vmem:[#allocation6 + $0x2a8] ss:$16 sps:$4 sm:$0xff]   ;;  %v3447_v23 = vld [vmem:[#allocation6 + $0x8c] ss:$16 sps:$4 sm:$0xff]  }
 0x17d   :  { %v3424_v19 = vld [vmem:[#allocation6 + $0x700] ss:$16 sps:$4 sm:$0xff]  }
 0x17f   :  { %2123 = vmatpush1.bf16.msra.mxu0 %v3367_v20  ;;  %2164 = vmatpush1.bf16.msra.mxu1 %v3370_v21  ;;  %v3450_v20 = vld [vmem:[#allocation6 + $0x28c] ss:$16 sps:$4 sm:$0xff]   ;;  %v3445_v21 = vld [vmem:[#allocation6 + $0x88] ss:$16 sps:$4 sm:$0xff]  }
 0x180   :  { %2124 = vmatprep.subr.bf16.mxu0 %v3375_v22  ;;  %2165 = vmatprep.subr.bf16.mxu1 %v3378_v24  ;;  %v3453_v22 = vld [vmem:[#allocation6 + $0x6c] ss:$16 sps:$4 sm:$0xff]   ;;  %v3451_v24 = vld [vmem:[#allocation6 + $0x68] ss:$16 sps:$4 sm:$0xff]  }
 0x183   :  { %2125 = vmatpush1.bf16.msra.mxu0 %v3373_v25  ;;  %2166 = vmatpush1.bf16.msra.mxu1 %v3376_v26  ;;  %v3454_v25 = vld [vmem:[#allocation6 + $0x268] ss:$16 sps:$4 sm:$0xff]   ;;  %v3459_v26 = vld [vmem:[#allocation6 + $0x4c] ss:$16 sps:$4 sm:$0xff]  }
 0x184   :  { %2126 = vmatprep.subr.bf16.mxu0 %v3381_v27  ;;  %2167 = vmatprep.subr.bf16.mxu1 %v3384_v28  ;;  %v3462_v27 = vld [vmem:[#allocation6 + $0x24c] ss:$16 sps:$4 sm:$0xff]   ;;  %v3457_v28 = vld [vmem:[#allocation6 + $0x48] ss:$16 sps:$4 sm:$0xff]  }
 0x187   :  { %2127 = vmatpush2.bf16.msra.mxu0 %v3379_v29  ;;  %2168 = vmatpush2.bf16.msra.mxu1 %v3382_v30  ;;  %v3460_v29 = vld [vmem:[#allocation6 + $0x248] ss:$16 sps:$4 sm:$0xff]   ;;  %v3465_v30 = vld [vmem:[#allocation6 + $0x2c] ss:$16 sps:$4 sm:$0xff]  }
 0x188   :  { %2128 = vmatprep.subr.bf16.mxu0 %v3387_v31  ;;  %2169 = vmatprep.subr.bf16.mxu1 %v3390_v32  ;;  %v3468_v31 = vld [vmem:[#allocation6 + $0x22c] ss:$16 sps:$4 sm:$0xff]   ;;  %v3463_v32 = vld [vmem:[#allocation6 + $0x28] ss:$16 sps:$4 sm:$0xff]  }
 0x18b   :  { %2129 = vmatpush2.bf16.msra.mxu0 %v3385_v33  ;;  %2170 = vmatpush2.bf16.msra.mxu1 %v3388_v34  ;;  %v3466_v33 = vld [vmem:[#allocation6 + $0x228] ss:$16 sps:$4 sm:$0xff]   ;;  %v3471_v34 = vld [vmem:[#allocation6 + $0xc] ss:$16 sps:$4 sm:$0xff]  }
 0x18c   :  { %2130 = vmatprep.subr.bf16.mxu0 %v3393_v36  ;;  %2171 = vmatprep.subr.bf16.mxu1 %v3396_v41  ;;  %v3474_v36 = vld [vmem:[#allocation6 + $0x20c] ss:$16 sps:$4 sm:$0xff]   ;;  %v3469_v41 = vld [vmem:[#allocation6 + $0x8] ss:$16 sps:$4 sm:$0xff]  }
 0x18f   :  { %2131 = vmatpush2.bf16.msra.mxu0 %v3391_v42  ;;  %2172 = vmatpush2.bf16.msra.mxu1 %v3394_v38  ;;  %v3472_v42 = vld [vmem:[#allocation6 + $0x208] ss:$16 sps:$4 sm:$0xff]   ;;  %v3477_v38 = vld [vmem:[#allocation6 + $0x1ec] ss:$16 sps:$4 sm:$0xff]  }
 0x190   :  { %2132 = vmatprep.subr.bf16.mxu0 %v3399_v43  ;;  %2173 = vmatprep.subr.bf16.mxu1 %v3402_v44  ;;  %v3480_v43 = vld [vmem:[#allocation6 + $0x3ec] ss:$16 sps:$4 sm:$0xff]   ;;  %v3475_v44 = vld [vmem:[#allocation6 + $0x1e8] ss:$16 sps:$4 sm:$0xff]  }
 0x193   :  { %2133 = vmatpush2.bf16.msra.mxu0 %v3397_v47  ;;  %2174 = vmatpush2.bf16.msra.mxu1 %v3400_v49  ;;  %v3478_v47 = vld [vmem:[#allocation6 + $0x3e8] ss:$16 sps:$4 sm:$0xff]   ;;  %v3483_v49 = vld [vmem:[#allocation6 + $0x1cc] ss:$16 sps:$4 sm:$0xff]  }
 0x194   :  { %2134 = vmatprep.subr.bf16.mxu0 %v3405_v60  ;;  %2175 = vmatprep.subr.bf16.mxu1 %v3408_v35  ;;  %v3486_v60 = vld [vmem:[#allocation6 + $0x3cc] ss:$16 sps:$4 sm:$0xff]   ;;  %v3481_v35 = vld [vmem:[#allocation6 + $0x1c8] ss:$16 sps:$4 sm:$0xff]  }
 0x197   :  { %2135 = vmatpush2.bf16.msra.mxu0 %v3403_v50  ;;  %2176 = vmatpush2.bf16.msra.mxu1 %v3406_v51  ;;  %v3484_v50 = vld [vmem:[#allocation6 + $0x3c8] ss:$16 sps:$4 sm:$0xff]   ;;  %v3489_v51 = vld [vmem:[#allocation6 + $0x1ac] ss:$16 sps:$4 sm:$0xff]  }
 0x198   :  { %2136 = vmatprep.subr.bf16.mxu0 %v3411_v61  ;;  %2177 = vmatprep.subr.bf16.mxu1 %v3414_v63  ;;  %v3492_v61 = vld [vmem:[#allocation6 + $0x3ac] ss:$16 sps:$4 sm:$0xff]   ;;  %v3487_v63 = vld [vmem:[#allocation6 + $0x1a8] ss:$16 sps:$4 sm:$0xff]  }
 0x19b   :  { %2137 = vmatpush2.bf16.msra.mxu0 %v3409_v0  ;;  %2178 = vmatpush2.bf16.msra.mxu1 %v3412_v56  ;;  %v3490_v0 = vld [vmem:[#allocation6 + $0x3a8] ss:$16 sps:$4 sm:$0xff]   ;;  %v3495_v56 = vld [vmem:[#allocation6 + $0x18c] ss:$16 sps:$4 sm:$0xff]  }
 0x19c   :  { %2138 = vmatprep.subr.bf16.mxu0 %v3417_v1  ;;  %2179 = vmatprep.subr.bf16.mxu1 %v3420_v2  ;;  %v3498_v1 = vld [vmem:[#allocation6 + $0x38c] ss:$16 sps:$4 sm:$0xff]   ;;  %v3493_v2 = vld [vmem:[#allocation6 + $0x188] ss:$16 sps:$4 sm:$0xff]  }
 0x19f   :  { %2139 = vmatpush2.bf16.msra.mxu0 %v3415_v53  ;;  %2180 = vmatpush2.bf16.msra.mxu1 %v3418_v54  ;;  %v3496_v53 = vld [vmem:[#allocation6 + $0x388] ss:$16 sps:$4 sm:$0xff]   ;;  %v3501_v54 = vld [vmem:[#allocation6 + $0x16c] ss:$16 sps:$4 sm:$0xff]  }
 0x1a0   :  { %2140 = vmatprep.subr.bf16.mxu0 %v3423_v58  ;;  %2181 = vmatprep.subr.bf16.mxu1 %v3426_v59  ;;  %v3504_v58 = vld [vmem:[#allocation6 + $0x36c] ss:$16 sps:$4 sm:$0xff]   ;;  %v3499_v59 = vld [vmem:[#allocation6 + $0x168] ss:$16 sps:$4 sm:$0xff]  }
 0x1a3   :  { %2141 = vmatpush2.bf16.msra.mxu0 %v3421_v3  ;;  %2182 = vmatpush2.bf16.msra.mxu1 %v3424_v19  ;;  %v3502_v3 = vld [vmem:[#allocation6 + $0x368] ss:$16 sps:$4 sm:$0xff]   ;;  %v3507_v19 = vld [vmem:[#allocation6 + $0x14c] ss:$16 sps:$4 sm:$0xff]  }
 0x1a4   :  { %2192 = vmatprep.subr.bf16.mxu0 %v3429_v37  ;;  %2233 = vmatprep.subr.bf16.mxu1 %v3432_v57  ;;  %v3510_v37 = vld [vmem:[#allocation6 + $0x34c] ss:$16 sps:$4 sm:$0xff]   ;;  %v3505_v57 = vld [vmem:[#allocation6 + $0x148] ss:$16 sps:$4 sm:$0xff]  }
 0x1a6   :  { %2143 = vmatmul.mubr.bf16.vlgmr.msra.gmra.mxu0 %v4015_v6  ;;  %2184 = vmatmul.mubr.bf16.vlgmr.msra.gmra.mxu1 %v4019_v7 }
 0x1a7   :  { %2193 = vmatpush1.bf16.msra.mxu0 %v3427_v5  ;;  %2224 = vmatprep.mubr.bf16.mxu0 %v3988_v45  ;;  %v3448_v45 = vld [vmem:[#allocation6 + $0x288] ss:$16 sps:$4 sm:$0xff]  }
 0x1a8   :  { %2234 = vmatpush1.bf16.msra.mxu1 %v3430_v8  ;;  %2265 = vmatprep.mubr.bf16.mxu1 %v3990_v39  ;;  %v3456_v39 = vld [vmem:[#allocation6 + $0x26c] ss:$16 sps:$4 sm:$0xff]   ;;  %v3508_v5 = vld [vmem:[#allocation6 + $0x348] ss:$16 sps:$4 sm:$0xff]  }
 0x1a9   :  { %2194 = vmatprep.subr.bf16.mxu0 %v3435_v9  ;;  %2235 = vmatprep.subr.bf16.mxu1 %v3438_v10  ;;  %v3513_v8 = vld [vmem:[#allocation6 + $0x12c] ss:$16 sps:$4 sm:$0xff]   ;;  %v3511_v10 = vld [vmem:[#allocation6 + $0x128] ss:$16 sps:$4 sm:$0xff]  }
 0x1aa   :  { %v3516_v9 = vld [vmem:[#allocation6 + $0x32c] ss:$16 sps:$4 sm:$0xff]  }
 0x1ab   :  { %2195 = vmatpush1.bf16.msra.mxu0 %v3433_v11  ;;  %v3514_v11 = vld [vmem:[#allocation6 + $0x328] ss:$16 sps:$4 sm:$0xff]  }
 0x1ac   :  { %2236 = vmatpush1.bf16.msra.mxu1 %v3436_v55  ;;  %2196 = vmatprep.subr.bf16.mxu0 %v3441_v12  ;;  %v3519_v55 = vld [vmem:[#allocation6 + $0x10c] ss:$16 sps:$4 sm:$0xff]  }
 0x1ad   :  { %2237 = vmatprep.subr.bf16.mxu1 %v3444_v4  ;;  %v3522_v12 = vld [vmem:[#allocation6 + $0x30c] ss:$16 sps:$4 sm:$0xff]   ;;  %v3517_v4 = vld [vmem:[#allocation6 + $0x108] ss:$16 sps:$4 sm:$0xff]  }
 0x1af   :  { %2197 = vmatpush1.bf16.msra.mxu0 %v3439_v15  ;;  %v3520_v15 = vld [vmem:[#allocation6 + $0x308] ss:$16 sps:$4 sm:$0xff]  }
 0x1b0   :  { %2238 = vmatpush1.bf16.msra.mxu1 %v3442_v16  ;;  %2198 = vmatprep.subr.bf16.mxu0 %v3447_v23  ;;  %v3525_v16 = vld [vmem:[#allocation6 + $0x4ec] ss:$16 sps:$4 sm:$0xff]  }
 0x1b1   :  { %2239 = vmatprep.subr.bf16.mxu1 %v3450_v20  ;;  %v3528_v23 = vld [vmem:[#allocation6 + $0x6ec] ss:$16 sps:$4 sm:$0xff]   ;;  %v3523_v20 = vld [vmem:[#allocation6 + $0x4e8] ss:$16 sps:$4 sm:$0xff]  }
 0x1b3   :  { %2199 = vmatpush1.bf16.msra.mxu0 %v3445_v21  ;;  %v3526_v21 = vld [vmem:[#allocation6 + $0x6e8] ss:$16 sps:$4 sm:$0xff]  }
 0x1b4   :  { %2240 = vmatpush1.bf16.msra.mxu1 %v3448_v45  ;;  %2200 = vmatprep.subr.bf16.mxu0 %v3453_v22  ;;  %v3531_v45 = vld [vmem:[#allocation6 + $0x4cc] ss:$16 sps:$4 sm:$0xff]  }
 0x1b5   :  { %2241 = vmatprep.subr.bf16.mxu1 %v3456_v39  ;;  %v3534_v22 = vld [vmem:[#allocation6 + $0x6cc] ss:$16 sps:$4 sm:$0xff]   ;;  %v3529_v39 = vld [vmem:[#allocation6 + $0x4c8] ss:$16 sps:$4 sm:$0xff]  }
 0x1b7   :  { %2201 = vmatpush1.bf16.msra.mxu0 %v3451_v24  ;;  %v3532_v24 = vld [vmem:[#allocation6 + $0x6c8] ss:$16 sps:$4 sm:$0xff]  }
 0x1b8   :  { %2242 = vmatpush1.bf16.msra.mxu1 %v3454_v25  ;;  %2202 = vmatprep.subr.bf16.mxu0 %v3459_v26  ;;  %v3537_v25 = vld [vmem:[#allocation6 + $0x4ac] ss:$16 sps:$4 sm:$0xff]  }
 0x1b9   :  { %2243 = vmatprep.subr.bf16.mxu1 %v3462_v27  ;;  %v3540_v26 = vld [vmem:[#allocation6 + $0x6ac] ss:$16 sps:$4 sm:$0xff]   ;;  %v3535_v27 = vld [vmem:[#allocation6 + $0x4a8] ss:$16 sps:$4 sm:$0xff]  }
 0x1bb   :  { %2203 = vmatpush1.bf16.msra.mxu0 %v3457_v28  ;;  %v3543_v28 = vld [vmem:[#allocation6 + $0x48c] ss:$16 sps:$4 sm:$0xff]  }
 0x1bc   :  { %2244 = vmatpush1.bf16.msra.mxu1 %v3460_v29  ;;  %2204 = vmatprep.subr.bf16.mxu0 %v3465_v30  ;;  %v3541_v29 = vld [vmem:[#allocation6 + $0x488] ss:$16 sps:$4 sm:$0xff]   ;;  %v3549_v30 = vld [vmem:[#allocation6 + $0x46c] ss:$16 sps:$4 sm:$0xff]  }
 0x1bd   :  { %2245 = vmatprep.subr.bf16.mxu1 %v3468_v31  ;;  %v3552_v31 = vld [vmem:[#allocation6 + $0x66c] ss:$16 sps:$4 sm:$0xff]  }
 0x1bf   :  { %2205 = vmatpush1.bf16.msra.mxu0 %v3463_v32  ;;  %v3550_v32 = vld [vmem:[#allocation6 + $0x668] ss:$16 sps:$4 sm:$0xff]  }
 0x1c0   :  { %2246 = vmatpush1.bf16.msra.mxu1 %v3466_v33  ;;  %2206 = vmatprep.subr.bf16.mxu0 %v3471_v34  ;;  %v3555_v33 = vld [vmem:[#allocation6 + $0x44c] ss:$16 sps:$4 sm:$0xff]  }
 0x1c1   :  { %2247 = vmatprep.subr.bf16.mxu1 %v3474_v36  ;;  %v3558_v34 = vld [vmem:[#allocation6 + $0x64c] ss:$16 sps:$4 sm:$0xff]   ;;  %v3553_v36 = vld [vmem:[#allocation6 + $0x448] ss:$16 sps:$4 sm:$0xff]  }
 0x1c3   :  { %2207 = vmatpush1.bf16.msra.mxu0 %v3469_v41  ;;  %v3556_v41 = vld [vmem:[#allocation6 + $0x648] ss:$16 sps:$4 sm:$0xff]  }
 0x1c4   :  { %2248 = vmatpush1.bf16.msra.mxu1 %v3472_v42  ;;  %2208 = vmatprep.subr.bf16.mxu0 %v3477_v38  ;;  %v3561_v42 = vld [vmem:[#allocation6 + $0x42c] ss:$16 sps:$4 sm:$0xff]  }
 0x1c5   :  { %2249 = vmatprep.subr.bf16.mxu1 %v3480_v43  ;;  %v3564_v38 = vld [vmem:[#allocation6 + $0x62c] ss:$16 sps:$4 sm:$0xff]   ;;  %v3559_v43 = vld [vmem:[#allocation6 + $0x428] ss:$16 sps:$4 sm:$0xff]  }
 0x1c7   :  { %2209 = vmatpush2.bf16.msra.mxu0 %v3475_v44  ;;  %v3562_v44 = vld [vmem:[#allocation6 + $0x628] ss:$16 sps:$4 sm:$0xff]  }
 0x1c8   :  { %2250 = vmatpush2.bf16.msra.mxu1 %v3478_v47  ;;  %2210 = vmatprep.subr.bf16.mxu0 %v3483_v49  ;;  %v3567_v47 = vld [vmem:[#allocation6 + $0x40c] ss:$16 sps:$4 sm:$0xff]  }
 0x1c9   :  { %2251 = vmatprep.subr.bf16.mxu1 %v3486_v60  ;;  %v3570_v49 = vld [vmem:[#allocation6 + $0x60c] ss:$16 sps:$4 sm:$0xff]   ;;  %v3565_v60 = vld [vmem:[#allocation6 + $0x408] ss:$16 sps:$4 sm:$0xff]  }
 0x1cb   :  { %2211 = vmatpush2.bf16.msra.mxu0 %v3481_v35  ;;  %v3568_v35 = vld [vmem:[#allocation6 + $0x608] ss:$16 sps:$4 sm:$0xff]  }
 0x1cc   :  { %2252 = vmatpush2.bf16.msra.mxu1 %v3484_v50  ;;  %2212 = vmatprep.subr.bf16.mxu0 %v3489_v51  ;;  %v3573_v50 = vld [vmem:[#allocation6 + $0x5ec] ss:$16 sps:$4 sm:$0xff]  }
 0x1cd   :  { %2253 = vmatprep.subr.bf16.mxu1 %v3492_v61  ;;  %v3576_v51 = vld [vmem:[#allocation6 + $0x7ec] ss:$16 sps:$4 sm:$0xff]   ;;  %v3571_v61 = vld [vmem:[#allocation6 + $0x5e8] ss:$16 sps:$4 sm:$0xff]  }
 0x1cf   :  { %2213 = vmatpush2.bf16.msra.mxu0 %v3487_v63  ;;  %v3574_v63 = vld [vmem:[#allocation6 + $0x7e8] ss:$16 sps:$4 sm:$0xff]  }
 0x1d0   :  { %2254 = vmatpush2.bf16.msra.mxu1 %v3490_v0  ;;  %2214 = vmatprep.subr.bf16.mxu0 %v3495_v56  ;;  %v3579_v0 = vld [vmem:[#allocation6 + $0x5cc] ss:$16 sps:$4 sm:$0xff]  }
 0x1d1   :  { %2255 = vmatprep.subr.bf16.mxu1 %v3498_v1  ;;  %v3582_v56 = vld [vmem:[#allocation6 + $0x7cc] ss:$16 sps:$4 sm:$0xff]   ;;  %v3577_v1 = vld [vmem:[#allocation6 + $0x5c8] ss:$16 sps:$4 sm:$0xff]  }
 0x1d3   :  { %2215 = vmatpush2.bf16.msra.mxu0 %v3493_v2  ;;  %v3580_v2 = vld [vmem:[#allocation6 + $0x7c8] ss:$16 sps:$4 sm:$0xff]  }
 0x1d4   :  { %2256 = vmatpush2.bf16.msra.mxu1 %v3496_v53  ;;  %2216 = vmatprep.subr.bf16.mxu0 %v3501_v54  ;;  %v3585_v53 = vld [vmem:[#allocation6 + $0x5ac] ss:$16 sps:$4 sm:$0xff]  }
 0x1d5   :  { %2257 = vmatprep.subr.bf16.mxu1 %v3504_v58  ;;  %v3588_v54 = vld [vmem:[#allocation6 + $0x7ac] ss:$16 sps:$4 sm:$0xff]   ;;  %v3583_v58 = vld [vmem:[#allocation6 + $0x5a8] ss:$16 sps:$4 sm:$0xff]  }
 0x1d7   :  { %2217 = vmatpush2.bf16.msra.mxu0 %v3499_v59  ;;  %v3586_v59 = vld [vmem:[#allocation6 + $0x7a8] ss:$16 sps:$4 sm:$0xff]  }
 0x1d8   :  { %2258 = vmatpush2.bf16.msra.mxu1 %v3502_v3  ;;  %2218 = vmatprep.subr.bf16.mxu0 %v3507_v19  ;;  %v3591_v3 = vld [vmem:[#allocation6 + $0x58c] ss:$16 sps:$4 sm:$0xff]  }
 0x1d9   :  { %2259 = vmatprep.subr.bf16.mxu1 %v3510_v37  ;;  %v3594_v19 = vld [vmem:[#allocation6 + $0x78c] ss:$16 sps:$4 sm:$0xff]   ;;  %v3589_v37 = vld [vmem:[#allocation6 + $0x588] ss:$16 sps:$4 sm:$0xff]  }
 0x1db   :  { %2219 = vmatpush2.bf16.msra.mxu0 %v3505_v57  ;;  %v3592_v57 = vld [vmem:[#allocation6 + $0x788] ss:$16 sps:$4 sm:$0xff]  }
 0x1dc   :  { %2260 = vmatpush2.bf16.msra.mxu1 %v3508_v5  ;;  %2220 = vmatprep.subr.bf16.mxu0 %v3513_v8  ;;  %v3597_v5 = vld [vmem:[#allocation6 + $0x56c] ss:$16 sps:$4 sm:$0xff]  }
 0x1dd   :  { %2261 = vmatprep.subr.bf16.mxu1 %v3516_v9  ;;  %v3600_v8 = vld [vmem:[#allocation6 + $0x76c] ss:$16 sps:$4 sm:$0xff]   ;;  %v3595_v9 = vld [vmem:[#allocation6 + $0x568] ss:$16 sps:$4 sm:$0xff]  }
 0x1df   :  { %2221 = vmatpush2.bf16.msra.mxu0 %v3511_v10  ;;  %v3598_v10 = vld [vmem:[#allocation6 + $0x768] ss:$16 sps:$4 sm:$0xff]  }
 0x1e0   :  { %2262 = vmatpush2.bf16.msra.mxu1 %v3514_v11  ;;  %2222 = vmatprep.subr.bf16.mxu0 %v3519_v55  ;;  %v3603_v11 = vld [vmem:[#allocation6 + $0x54c] ss:$16 sps:$4 sm:$0xff]  }
 0x1e1   :  { %2263 = vmatprep.subr.bf16.mxu1 %v3522_v12  ;;  %v3606_v55 = vld [vmem:[#allocation6 + $0x74c] ss:$16 sps:$4 sm:$0xff]   ;;  %v3601_v12 = vld [vmem:[#allocation6 + $0x548] ss:$16 sps:$4 sm:$0xff]  }
 0x1e3   :  { %2223 = vmatpush2.bf16.msra.mxu0 %v3517_v4  ;;  %v3604_v4 = vld [vmem:[#allocation6 + $0x748] ss:$16 sps:$4 sm:$0xff]  }
 0x1e4   :  { %2264 = vmatpush2.bf16.msra.mxu1 %v3520_v15  ;;  %2274 = vmatprep.subr.bf16.mxu0 %v3525_v16  ;;  %v3609_v15 = vld [vmem:[#allocation6 + $0x52c] ss:$16 sps:$4 sm:$0xff]  }
 0x1e5   :  { %2315 = vmatprep.subr.bf16.mxu1 %v3528_v23  ;;  %v3612_v16 = vld [vmem:[#allocation6 + $0x72c] ss:$16 sps:$4 sm:$0xff]   ;;  %v3607_v23 = vld [vmem:[#allocation6 + $0x528] ss:$16 sps:$4 sm:$0xff]  }
 0x1e6   :  { %2225 = vmatmul.mubr.bf16.vlgmr.msra.gmra.mxu0 %v3992_v48  ;;  %v3538_v48 = vld [vmem:[#allocation6 + $0x6a8] ss:$16 sps:$4 sm:$0xff]  }
 0x1e7   :  { %2266 = vmatmul.mubr.bf16.vlgmr.msra.gmra.mxu1 %v3994_v46  ;;  %2275 = vmatpush1.bf16.msra.mxu0 %v3523_v20  ;;  %v3546_v46 = vld [vmem:[#allocation6 + $0x68c] ss:$16 sps:$4 sm:$0xff]   ;;  %v3610_v20 = vld [vmem:[#allocation6 + $0x728] ss:$16 sps:$4 sm:$0xff]  }
 0x1e8   :  { %2306 = vmatprep.mubr.bf16.mxu0 %v4000_v62  ;;  %2316 = vmatpush1.bf16.msra.mxu1 %v3526_v21  ;;  %v3544_v62 = vld [vmem:[#allocation6 + $0x688] ss:$16 sps:$4 sm:$0xff]   ;;  %v3615_v21 = vld [vmem:[#allocation6 + $0x50c] ss:$16 sps:$4 sm:$0xff]  }
 0x1e9   :  { %2347 = vmatprep.mubr.bf16.mxu1 %v4002_v52  ;;  %2276 = vmatprep.subr.bf16.mxu0 %v3531_v45  ;;  %v3547_v52 = vld [vmem:[#allocation6 + $0x468] ss:$16 sps:$4 sm:$0xff]   ;;  %v3618_v45 = vld [vmem:[#allocation6 + $0x70c] ss:$16 sps:$4 sm:$0xff]  }
 0x1ea   :  { %2317 = vmatprep.subr.bf16.mxu1 %v3534_v22  ;;  %v3613_v22 = vld [vmem:[#allocation6 + $0x508] ss:$16 sps:$4 sm:$0xff]  }
 0x1eb   :  { %2277 = vmatpush1.bf16.msra.mxu0 %v3529_v39  ;;  %v3616_v39 = vld [vmem:[#allocation6 + $0x708] ss:$16 sps:$4 sm:$0xff]  }
 0x1ec   :  { %2318 = vmatpush1.bf16.msra.mxu1 %v3532_v24  ;;  %2278 = vmatprep.subr.bf16.mxu0 %v3537_v25  ;;  %v3619_v24 = vld [vmem:[#allocation8 + $0x78] sm:$0xff]  }
 0x1ed   :  { %2319 = vmatprep.subr.bf16.mxu1 %v3540_v26  ;;  %v3620_v25 = vld [vmem:[#allocation8 + $0x38] sm:$0xff]   ;;  %v3621_v26 = vld [vmem:[#allocation8 + $0x70] sm:$0xff]  }
 0x1ef   :  { %2279 = vmatpush1.bf16.msra.mxu0 %v3535_v27 }
 0x1f0   :  { %2320 = vmatpush1.bf16.msra.mxu1 %v3538_v48  ;;  %2280 = vmatprep.subr.bf16.mxu0 %v3543_v28  ;;  %v3622_v28 = vld [vmem:[#allocation8 + $0x30] sm:$0xff]  }
 0x1f1   :  { %2321 = vmatprep.subr.bf16.mxu1 %v3546_v46 }
 0x1f3   :  { %2281 = vmatpush1.bf16.msra.mxu0 %v3541_v29 }
 0x1f4   :  { %2322 = vmatpush1.bf16.msra.mxu1 %v3544_v62  ;;  %2282 = vmatprep.subr.bf16.mxu0 %v3549_v30  ;;  %v3623_v62 = vld [vmem:[#allocation8 + $0x68] sm:$0xff]  }
 0x1f5   :  { %2323 = vmatprep.subr.bf16.mxu1 %v3552_v31 }
 0x1f7   :  { %2283 = vmatpush1.bf16.msra.mxu0 %v3547_v52  ;;  %v3624_v52 = vld [vmem:[#allocation8 + $0x28] sm:$0xff]  }
 0x1f8   :  { %2324 = vmatpush1.bf16.msra.mxu1 %v3550_v32  ;;  %2284 = vmatprep.subr.bf16.mxu0 %v3555_v33 }
 0x1f9   :  { %2325 = vmatprep.subr.bf16.mxu1 %v3558_v34  ;;  %v3625_v34 = vld [vmem:[#allocation8 + $0x60] sm:$0xff]  }
 0x1fb   :  { %2285 = vmatpush1.bf16.msra.mxu0 %v3553_v36  ;;  %v3635_v36 = vld [vmem:[#allocation8 + $0xf8] sm:$0xff]  }
 0x1fc   :  { %2326 = vmatpush1.bf16.msra.mxu1 %v3556_v41  ;;  %2286 = vmatprep.subr.bf16.mxu0 %v3561_v42  ;;  %v3637_v41 = vld [vmem:[#allocation8 + $0xf0] sm:$0xff]   ;;  %v3626_v42 = vld [vmem:[#allocation8 + $0x20] sm:$0xff]  }
 0x1fd   :  { %2327 = vmatprep.subr.bf16.mxu1 %v3564_v38  ;;  %v3638_v38 = vld [vmem:[#allocation8 + $0xb0] sm:$0xff]  }
 0x1ff   :  { %2287 = vmatpush1.bf16.msra.mxu0 %v3559_v43  ;;  %v3639_v43 = vld [vmem:[#allocation8 + $0xe8] sm:$0xff]  }
 0x200   :  { %2328 = vmatpush1.bf16.msra.mxu1 %v3562_v44  ;;  %2288 = vmatprep.subr.bf16.mxu0 %v3567_v47  ;;  %v3628_v44 = vld [vmem:[#allocation8 + $0x18] sm:$0xff]   ;;  %v3629_v47 = vld [vmem:[#allocation8 + $0x50] sm:$0xff]  }
 0x201   :  { %2329 = vmatprep.subr.bf16.mxu1 %v3570_v49  ;;  %v3640_v49 = vld [vmem:[#allocation8 + $0xa8] sm:$0xff]  }
 0x203   :  { %2289 = vmatpush1.bf16.msra.mxu0 %v3565_v60  ;;  %v3641_v60 = vld [vmem:[#allocation8 + $0xe0] sm:$0xff]  }
 0x204   :  { %2330 = vmatpush1.bf16.msra.mxu1 %v3568_v35  ;;  %2290 = vmatprep.subr.bf16.mxu0 %v3573_v50  ;;  %v3630_v35 = vld [vmem:[#allocation8 + $0x10] sm:$0xff]   ;;  %v3631_v50 = vld [vmem:[#allocation8 + $0x48] sm:$0xff]  }
 0x205   :  { %2331 = vmatprep.subr.bf16.mxu1 %v3576_v51  ;;  %v3642_v51 = vld [vmem:[#allocation8 + $0xa0] sm:$0xff]  }
 0x207   :  { %2291 = vmatpush2.bf16.msra.mxu0 %v3571_v61  ;;  %v3643_v61 = vld [vmem:[#allocation8 + $0xd8] sm:$0xff]  }
 0x208   :  { %2332 = vmatpush2.bf16.msra.mxu1 %v3574_v63  ;;  %2292 = vmatprep.subr.bf16.mxu0 %v3579_v0  ;;  %v3632_v63 = vld [vmem:[#allocation8 + $0x8] sm:$0xff]   ;;  %v3633_v0 = vld [vmem:[#allocation8 + $0x40] sm:$0xff]  }
 0x209   :  { %2333 = vmatprep.subr.bf16.mxu1 %v3582_v56  ;;  %v3644_v56 = vld [vmem:[#allocation8 + $0x98] sm:$0xff]  }
 0x20b   :  { %2293 = vmatpush2.bf16.msra.mxu0 %v3577_v1  ;;  %v3634_v1 = vld [vmem:[#allocation8] sm:$0xff]  }
 0x20c   :  { %2334 = vmatpush2.bf16.msra.mxu1 %v3580_v2  ;;  %2294 = vmatprep.subr.bf16.mxu0 %v3585_v53  ;;  %v4035_v2 = vld [vmem:[%s4066_s4] sm:$0xf] }
 0x20d   :  { %2335 = vmatprep.subr.bf16.mxu1 %v3588_v54  ;;  %v731_v53 = vrot.slane %v4035_v2, %v3900_v17  ;;  %v735_v54 = vrot.slane %v4035_v2, %v3890_v13  ;;  %v3646_v13 = vld [vmem:[#allocation8 + $0x90] sm:$0xff]  }
 0x20f   :  { %2295 = vmatpush2.bf16.msra.mxu0 %v3583_v58 }
 0x210   :  { %2336 = vmatpush2.bf16.msra.mxu1 %v3586_v59  ;;  %2296 = vmatprep.subr.bf16.mxu0 %v3591_v3 }
 0x211   :  { %2337 = vmatprep.subr.bf16.mxu1 %v3594_v19 }
 0x213   :  { %2297 = vmatpush2.bf16.msra.mxu0 %v3589_v37 }
 0x214   :  { %2338 = vmatpush2.bf16.msra.mxu1 %v3592_v57  ;;  %2298 = vmatprep.subr.bf16.mxu0 %v3597_v5 }
 0x215   :  { %2339 = vmatprep.subr.bf16.mxu1 %v3600_v8 }
 0x217   :  { %2299 = vmatpush2.bf16.msra.mxu0 %v3595_v9 }
 0x218   :  { %2340 = vmatpush2.bf16.msra.mxu1 %v3598_v10  ;;  %2300 = vmatprep.subr.bf16.mxu0 %v3603_v11 }
 0x219   :  { %2341 = vmatprep.subr.bf16.mxu1 %v3606_v55 }
 0x21b   :  { %2301 = vmatpush2.bf16.msra.mxu0 %v3601_v12 }
 0x21c   :  { %2342 = vmatpush2.bf16.msra.mxu1 %v3604_v4  ;;  %2302 = vmatprep.subr.bf16.mxu0 %v3609_v15 }
 0x21d   :  { %2343 = vmatprep.subr.bf16.mxu1 %v3612_v16 }
 0x21f   :  { %2303 = vmatpush2.bf16.msra.mxu0 %v3607_v23 }
 0x220   :  { %2344 = vmatpush2.bf16.msra.mxu1 %v3610_v20  ;;  %2304 = vmatprep.subr.bf16.mxu0 %v3615_v21  ;;  %v3645_v20 = vld [vmem:[#allocation8 + $0xd0] sm:$0xff]  }
 0x221   :  { %2345 = vmatprep.subr.bf16.mxu1 %v3618_v45  ;;  %v3647_v45 = vld [vmem:[#allocation8 + $0xc8] sm:$0xff]  }
 0x223   :  { %2305 = vmatpush2.bf16.msra.mxu0 %v3613_v22 }
 0x224   :  { %2346 = vmatpush2.bf16.msra.mxu1 %v3616_v39  ;;  %3136 = vmatprep.subr.bf16.mxu0 %v3619_v24  ;;  %v3648_v39 = vld [vmem:[#allocation8 + $0x88] sm:$0xff]   ;;  %v3649_v24 = vld [vmem:[#allocation8 + $0xc0] sm:$0xff]  }
 0x225   :  { %3158 = vmatprep.subr.bf16.mxu1 %v3635_v36  ;;  %v739_v36 = vrot.slane %v4035_v2, %v3903_v18 }
 0x226   :  { %2307 = vmatmul.mubr.bf16.vlgmr.msra.gmra.mxu0 %v4015_v6  ;;  %v2062_v27 = vpop.f32.mrf.mxu0  ;;  %v2103_v48 = vpop.f32.mrf.mxu1  ;;  %v3636_v6 = vld [vmem:[#allocation8 + $0xb8] sm:$0xff]  }
 0x227   :  { %2348 = vmatmul.mubr.bf16.vlgmr.msra.gmra.mxu1 %v4019_v7  ;;  %3137 = vmatpush3.bf16.msra.mxu0 %v3620_v25  ;;  %v3627_v7 = vld [vmem:[#allocation8 + $0x58] sm:$0xff]   ;;  %v2063_v58 = vadd.f32 %v2062_v27, %v731_v53  ;;  %v3650_v25 = vld [vmem:[#allocation8 + $0x80] sm:$0xff]  }
 0x228   :  { %v2064_v46 = vpop.f32.mrf.mxu0  ;;  %v2105_v29 = vpop.f32.mrf.mxu1  ;;  %3138 = vmatprep.subr.bf16.mxu0 %v3621_v26  ;;  %3159 = vmatpush3.bf16.msra.mxu1 %v3636_v6  ;;  %v743_v6 = vrot.slane %v4035_v2, %v3893_v14 }
 0x229   :  { %3160 = vmatprep.subr.bf16.mxu1 %v3637_v41  ;;  %v2065_v59 = vadd.f32 %v2064_v46, %v735_v54  ;;  %v2104_v3 = vadd.f32 %v2103_v48, %v2063_v58  ;;  %v3656_v54 = vld [vmem:[#allocation9 + $0x10] sm:$0xff]  }
 0x22a   :  { %v2066_v30 = vpop.f32.mrf.mxu0  ;;  %v2107_v31 = vpop.f32.mrf.mxu1 }
 0x22b   :  { %3139 = vmatpush3.bf16.msra.mxu0 %v3622_v28  ;;  %v2106_v57 = vadd.f32 %v2105_v29, %v2065_v59  ;;  %v3651_v31 = vld [vmem:[#allocation9 + $0x38] sm:$0xff]  }
 0x22c   :  { %v2067_v32 = vpop.f32.mrf.mxu0  ;;  %v2108_v33 = vpop.f32.mrf.mxu1  ;;  %3140 = vmatprep.subr.bf16.mxu0 %v3623_v62  ;;  %3161 = vmatpush3.bf16.msra.mxu1 %v3638_v38 }
 0x22d   :  { %3162 = vmatprep.subr.bf16.mxu1 %v3639_v43  ;;  %v3653_v32 = vld [vmem:[#allocation9 + $0x28] sm:$0xff]   ;;  %v3654_v33 = vld [vmem:[#allocation9 + $0x20] sm:$0xff]  }
 0x22f   :  { %3141 = vmatpush3.bf16.msra.mxu0 %v3624_v52  ;;  %v3652_v52 = vld [vmem:[#allocation9 + $0x30] sm:$0xff]  }
 0x230   :  { %3142 = vmatprep.subr.bf16.mxu0 %v3625_v34  ;;  %3163 = vmatpush3.bf16.msra.mxu1 %v3640_v49  ;;  %v3655_v34 = vld [vmem:[#allocation9 + $0x18] sm:$0xff]  }
 0x231   :  { %3164 = vmatprep.subr.bf16.mxu1 %v3641_v60 }
 0x233   :  { %3143 = vmatpush3.bf16.msra.mxu0 %v3626_v42 }
 0x234   :  { %3144 = vmatprep.subr.bf16.mxu0 %v3627_v7  ;;  %3165 = vmatpush3.bf16.msra.mxu1 %v3642_v51 }
 0x235   :  { %3166 = vmatprep.subr.bf16.mxu1 %v3643_v61 }
 0x237   :  { %3145 = vmatpush3.bf16.msra.mxu0 %v3628_v44 }
 0x238   :  { %3146 = vmatprep.subr.bf16.mxu0 %v3629_v47  ;;  %3167 = vmatpush3.bf16.msra.mxu1 %v3644_v56 }
 0x239   :  { %3168 = vmatprep.subr.bf16.mxu1 %v3645_v20 }
 0x23b   :  { %3147 = vmatpush3.bf16.msra.mxu0 %v3630_v35 }
 0x23c   :  { %3148 = vmatprep.subr.bf16.mxu0 %v3631_v50  ;;  %3169 = vmatpush3.bf16.msra.mxu1 %v3646_v13 }
 0x23d   :  { %3170 = vmatprep.subr.bf16.mxu1 %v3647_v45 }
 0x23f   :  { %3149 = vmatpush3.bf16.msra.mxu0 %v3632_v63 }
 0x240   :  { %3150 = vmatprep.subr.bf16.mxu0 %v3633_v0  ;;  %3171 = vmatpush3.bf16.msra.mxu1 %v3648_v39 }
 0x241   :  { %3172 = vmatprep.subr.bf16.mxu1 %v3649_v24 }
 0x243   :  { %3151 = vmatpush3.bf16.msra.mxu0 %v3634_v1 }
 0x244   :  { %3189 = vmatprep.subr.bf16.mxu0 %v3775_v40  ;;  %3173 = vmatpush3.bf16.msra.mxu1 %v3650_v25 }
 0x266   :  { %v2144_v19 = vpop.f32.mrf.mxu0  ;;  %v2185_v37 = vpop.f32.mrf.mxu1 }
 0x267   :  { %v2145_v5 = vadd.f32 %v2144_v19, %v2104_v3 }
 0x268   :  { %v2146_v8 = vpop.f32.mrf.mxu0  ;;  %v2187_v9 = vpop.f32.mrf.mxu1 }
 0x269   :  { %v2186_v10 = vadd.f32 %v2185_v37, %v2145_v5  ;;  %v2147_v11 = vadd.f32 %v2146_v8, %v2106_v57  ;;  %v3657_v37 = vld [vmem:[#allocation9 + $0x8] sm:$0xff]   ;;  %v3658_v57 = vld [vmem:[#allocation9] sm:$0xff]   ;;  %v3094_v5 = vld [vmem:[%s4068_s6] ss:$0 sm:$0xff]  ;;  %s3739_s6 = scalar_lea.vmem %s2828_s29, 128 }
 0x26a   :  { %v2148_v55 = vpop.f32.mrf.mxu0  ;;  %v2189_v12 = vpop.f32.mrf.mxu1  ;;  %p3740_p6 = scmp.ne.s32.totalorder %s2828_s29, %s3739_s6  ;;  %p3745_p8 = scmp.lt.s32.totalorder %s3739_s6, %s3739_s6 }
 0x26b   :  { %v2188_v4 = vadd.f32 %v2187_v9, %v2147_v11  ;;  %v2356_v15 = vmax.f32 %v2186_v10, 0.0 }
 0x26c   :  { %v2149_v16 = vpop.f32.mrf.mxu0  ;;  %v2190_v17 = vpop.f32.mrf.mxu1  ;;  %p3746_p9 = por %p3745_p8, %p3744_p7 }
 0x26d   :  { %v2357_v23 = vmax.f32 %v2188_v4, 0.0  ;;  %v2360_v22 = vpack.c.bf16 %v2356_v15, %v2356_v15  ;;  %v3127_v17 = vld [vmem:[%s4070_s8] ss:$0 sm:$0xff] }
 0x26e   :  { %p3747_p10 = pnand %p3746_p9, %p3740_p6 }
 0x26f   :  { %v2361_v21 = vpack.c.bf16 %v2357_v23, %v2357_v23 }
 0x271   :  { %2659 = vmatprep.mubr.bf16.mxu0 %v2361_v21 }
 0x272   :  { %2660 = vmatmul.mubr.bf16.vlgmr.msra.gmra.mxu0 %v2360_v22 }
 0x273   :  { %3190 = vmatpush3.bf16.msra.mxu0 %v3651_v31  ;;  %3205 = vmatprep.mubr.msk.bf16.mxu0 %vm3779_vm9, %v3775_v40 }
 0x274   :  { %3191 = vmatprep.subr.bf16.mxu0 %v3775_v40 }
 0x277   :  { %3192 = vmatpush3.bf16.msra.mxu0 %v3652_v52 }
 0x278   :  { %3193 = vmatprep.subr.bf16.mxu0 %v3775_v40 }
 0x27b   :  { %3194 = vmatpush3.bf16.msra.mxu0 %v3653_v32 }
 0x27c   :  { %3195 = vmatprep.subr.bf16.mxu0 %v3775_v40 }
 0x27f   :  { %3196 = vmatpush3.bf16.msra.mxu0 %v3654_v33 }
 0x280   :  { %3197 = vmatprep.subr.bf16.mxu0 %v3775_v40 }
 0x283   :  { %3198 = vmatpush3.bf16.msra.mxu0 %v3655_v34 }
 0x284   :  { %3199 = vmatprep.subr.bf16.mxu0 %v3775_v40 }
 0x287   :  { %3200 = vmatpush3.bf16.msra.mxu0 %v3656_v54 }
 0x288   :  { %3201 = vmatprep.subr.bf16.mxu0 %v3775_v40 }
 0x28b   :  { %3202 = vmatpush3.bf16.msra.mxu0 %v3657_v37 }
 0x28c   :  { %3203 = vmatprep.subr.bf16.mxu0 %v3775_v40 }
 0x28f   :  { %3204 = vmatpush3.bf16.msra.mxu0 %v3658_v57 }
 0x2a6   :  { %v2226_v26 = vpop.f32.mrf.mxu0 }
 0x2a7   :  { %v2267_v27 = vpop.f32.mrf.mxu1  ;;  %v2227_v41 = vadd.f32 %v2226_v26, %v739_v36 }
 0x2a8   :  { %v2228_v48 = vpop.f32.mrf.mxu0 }
 0x2a9   :  { %v2269_v28 = vpop.f32.mrf.mxu1  ;;  %v2229_v42 = vadd.f32 %v2228_v48, %v743_v6  ;;  %v2268_v7 = vadd.f32 %v2267_v27, %v2227_v41 }
 0x2aa   :  { %v2230_v46 = vpop.f32.mrf.mxu0 }
 0x2ab   :  { %v2271_v29 = vpop.f32.mrf.mxu1  ;;  %v2270_v43 = vadd.f32 %v2269_v28, %v2229_v42 }
 0x2ac   :  { %v2231_v62 = vpop.f32.mrf.mxu0 }
 0x2ad   :  { %v2272_v30 = vpop.f32.mrf.mxu1 }
 0x2e6   :  { %v2308_v38 = vpop.f32.mrf.mxu0 }
 0x2e7   :  { %v2309_v44 = vadd.f32 %v2308_v38, %v2268_v7  ;;  %v2349_v47 = vpop.f32.mrf.mxu1 }
 0x2e8   :  { %v2310_v49 = vpop.f32.mrf.mxu0 }
 0x2e9   :  { %v2350_v60 = vadd.f32 %v2349_v47, %v2309_v44  ;;  %v2311_v35 = vadd.f32 %v2310_v49, %v2270_v43  ;;  %v2351_v50 = vpop.f32.mrf.mxu1 }
 0x2ea   :  { %v2312_v51 = vpop.f32.mrf.mxu0 }
 0x2eb   :  { %v2352_v61 = vadd.f32 %v2351_v50, %v2311_v35  ;;  %v2353_v63 = vpop.f32.mrf.mxu1  ;;  %v2358_v0 = vmax.f32 %v2350_v60, 0.0 }
 0x2ec   :  { %v2313_v56 = vpop.f32.mrf.mxu0 }
 0x2ed   :  { %v2359_v18 = vmax.f32 %v2352_v61, 0.0  ;;  %v2354_v1 = vpop.f32.mrf.mxu1  ;;  %v2362_v14 = vpack.c.bf16 %v2358_v0, %v2358_v0 }
 0x2ef   :  { %v2363_v53 = vpack.c.bf16 %v2359_v18, %v2359_v18 }
 0x2f1   :  { %2699 = vmatprep.mubr.bf16.mxu1 %v2363_v53 }
 0x2f2   :  { %2700 = vmatmul.mubr.bf16.vlgmr.msra.gmra.mxu1 %v2362_v14 }
 0x332   :  { %v3152_v2 = vpop.f32.mrf.mxu0 }
 0x334   :  { %v3153_v58 = vpop.f32.mrf.mxu0 }
 0x335   :  { %v3154_v59 = vadd.f32 %v3153_v58, %v3152_v2 }
 0x336   :  { %v3155_v3 = vpop.f32.mrf.mxu0 }
 0x337   :  { %v2662_v10 = vadd.f32 %v3154_v59, %v3094_v5 }
 0x338   :  { %v3156_v19 = vpop.f32.mrf.mxu0 }
 0x3b2   :  { %v3174_v8 = vpop.f32.mrf.mxu1 }
 0x3b4   :  { %v3175_v9 = vpop.f32.mrf.mxu1 }
 0x3b5   :  { %v3176_v11 = vadd.f32 %v3175_v9, %v3174_v8 }
 0x3b6   :  { %v3177_v55 = vpop.f32.mrf.mxu1 }
 0x3b7   :  { %v2702_v12 = vadd.f32 %v3176_v11, %v2662_v10 }
 0x3b8   :  { %v3178_v4 = vpop.f32.mrf.mxu1 }
 0x3b9   :  { %v2707_v15 = vmax.f32 %v2702_v12, 0.0 }
 0x3bb   :  { %v2708_v16 = vpack.c.bf16 %v2707_v15, %v2707_v15 }
 0x3bd   :  { %3206 = vmatmul.mubr.bf16.vlgmr.msra.gmra.mxu0 %v2708_v16 }
 0x47d   :  { %v2814_v40 = vpop.f32.mrf.mxu0 }
 0x47e   :  { %v2815_v23 = vadd.f32 %v3127_v17, %v2814_v40 }
 0x47f   :  { %v3207_v20 = vpop.f32.mrf.mxu0 }
 0x480   :  { %2820 = vst [vmem:[#allocation11] sm:$0xff] %v2815_v23 }
 0x481   :  { %v2817_v13 = vpop.f32.mrf.mxu0 }
 0x482   :  { %3750 = shalt.err (!%p3747_p10)
}
 0x483   :  { %2830 = dma.vmem_to_hbm [thread:$0]  %s2828_s29, 128, %s4071_s9, [#allocation5]   ;;  %v3208_v21 = vpop.f32.mrf.mxu0 }
 0x484   :  { %3765 = dma.done.wait [#allocation5], 128  }
 0x485   :  { %3766 = vsyncadd [#allocation5], 4294967168 }
 0x486   :  { %2834 = vsyncpa [#allocation4], 1 }
 0x487   :  { %2835 = vsyncpa [#allocation7], 1 }
 0x488   :  { %2836 = vsyncpa [#allocation10], 1 }
 0x489   :  { %2837 = vsyncpa [#allocation5], 1 }

</bundles_post_ra>
